<compile_context>
chip_gen: v7x
topology: tpu7x:2x2x1
jax: 0.10.0
libtpu: 0.0.40
codegen_flags: <defaults>
</compile_context>

<pallas_src>
import math

import jax
import jax.numpy as jnp
from jax.experimental import pallas as pl
from jax.experimental.pallas import tpu as pltpu


def make_critic_kernel(S, TB, E, H, D, n_glimpses, mm_dtype, enc_unroll):
    """Builds the Pallas kernel body for fixed static shapes.

    Row layout of the packed parameter arrays (built in the wrapper):
      w4  [(2*(E+H)), 4H]  : wih_e^T (E rows) | whh_e^T (H rows) | wcat_p (E+H rows)
      wh  [2H, H]          : wq^T (H rows)    | wr^T (H rows)
      wd  [H, D]           : w1^T
      vec [11, 4H] f32     : be | bp | bq | br | v | psi | b1 | b2 | emb0 | emb1 | w2
    """
    f32 = jnp.float32
    H4 = 4 * H

    def kernel(x_ref, w4_ref, wh_ref, wd_ref, vec_ref, out_ref,
               xg_scratch, enc_scratch):
        def mm(a):                      # cast matmul operands (f32 -> mm_dtype or no-op)
            return a.astype(mm_dtype)

        # ---- packed parameter slices (static offsets, free) ----
        wih_e = w4_ref[0:E, :]                          # (E, 4H)
        whh_e = w4_ref[E:E + H, :]                      # (H, 4H)
        wcat_p = w4_ref[E + H:2 * (E + H), :]           # (E+H, 4H) fused process weights
        wq = wh_ref[0:H, :]                             # (H, H)
        wr = wh_ref[H:2 * H, :]                         # (H, H)
        w1 = wd_ref[...]                                # (H, D)

        be = vec_ref[0:1, :]                            # (1, 4H) f32
        bp = vec_ref[1:2, :]                            # (1, 4H) f32
        bq = vec_ref[2:3, 0:H]                          # (1, H)  f32
        br = vec_ref[3:4, 0:H]                          # (1, H)  f32
        v_row = vec_ref[4:5, 0:H]                       # (1, H)
        psi = vec_ref[5:6, 0:E]                         # (1, E)  f32
        b1 = vec_ref[6:7, 0:D]                          # (1, D)  f32
        b2 = vec_ref[7:8, 0:1]                          # (1, 1)  f32
        emb = vec_ref[8:10, 0:E]                        # (2, E)
        w2 = vec_ref[10:11, 0:D]                        # (1, D)

        # ---- GraphEmbedding + hoisted encoder input projection (two big MXU ops) ----
        x2 = x_ref[...].reshape(S * TB, 2)              # time-major (s*TB + b, 2)
        embedded = jnp.dot(mm(x2), mm(emb), preferred_element_type=f32)        # (S*TB, E)
        xg = jnp.dot(mm(embedded), wih_e, preferred_element_type=f32) + be     # (S*TB, 4H)
        xg_scratch[...] = xg.reshape(S, TB, H4)

        def lstm_gates(gates, c):
            # Full-width nonlinearities on the whole [TB, 4H] tile, then slice.
            sg = jax.nn.sigmoid(gates)
            th = jnp.tanh(gates)
            i = sg[:, 0:H]
            f = sg[:, H:2 * H]
            g = th[:, 2 * H:3 * H]
            o = sg[:, 3 * H:4 * H]
            c_new = f * c + i * g
            h_new = o * jnp.tanh(c_new)
            return h_new, c_new

        # ---- encoder LSTM recurrence: one dot + VPU per step ----
        def enc_step(t, carry):
            h, c = carry
            gates = xg_scratch[t] + jnp.dot(mm(h), whh_e, preferred_element_type=f32)
            h, c = lstm_gates(gates, c)
            enc_scratch[t] = h                           # contiguous (TB, H) store
            return (h, c)

        zeros = jnp.zeros((TB, H), f32)
        h, c = jax.lax.fori_loop(0, S, enc_step, (zeros, zeros), unroll=enc_unroll)

        # W_ref (1x1 conv) projection of encoder outputs; query-independent, shared
        # across process/glimpse iterations (numerically identical to the torch code).
        enc2 = enc_scratch[...].reshape(S * TB, H)
        refp = (jnp.dot(mm(enc2), wr, preferred_element_type=f32) + br).reshape(S, TB, H)

        # ---- 3-step process LSTM + Bahdanau glimpse attention ----
        proc_in = jnp.broadcast_to(psi, (TB, E))
        for _ in range(3):
            xin = jnp.concatenate([proc_in, h], axis=1)              # (TB, E+H)
            gates = jnp.dot(mm(xin), wcat_p, preferred_element_type=f32) + bp
            h, c = lstm_gates(gates, c)
            query = h
            for _ in range(n_glimpses):
                q = jnp.dot(mm(query), wq, preferred_element_type=f32) + bq      # (TB, H)
                t_act = jnp.tanh(refp + q[None, :, :])                           # (S, TB, H)
                logits = jax.lax.dot_general(                                    # (S*TB, 1)
                    mm(t_act.reshape(S * TB, H)), mm(v_row),
                    (((1,), (1,)), ((), ())), preferred_element_type=f32)
                logits = logits.reshape(S, TB, 1)
                m = jnp.max(logits, axis=0, keepdims=True)
                e = jnp.exp(logits - m)
                probs = e / jnp.sum(e, axis=0, keepdims=True)                    # (S, TB, 1)
                # seq-axis contraction = VPU adds across (TB, H) tiles
                query = jnp.sum(refp * probs, axis=0)                            # (TB, H)
            proc_in = query

        # ---- decoder head: Linear(H, D) -> ReLU -> Linear(D, 1), lane-dense output ----
        d1 = jnp.maximum(
            jnp.dot(mm(proc_in), w1, preferred_element_type=f32) + b1, 0.0)      # (TB, D)
        outv = jax.lax.dot_general(mm(w2), mm(d1), (((1,), (1,)), ((), ())),
                                   preferred_element_type=f32)                   # (1, TB)
        out_ref[...] = outv + b2

    return kernel


def critic_net_forward(x, params, *, seq_len, emb_size, hidden, d, n_glimpses=1,
                       matmul_dtype=jnp.float32):
    """Pallas-backed CriticNet forward. x: [B, 2, seq_len] float32 -> [B, 1]."""
    f32 = jnp.float32
    B = x.shape[0]
    H, E, S, D = hidden, emb_size, seq_len, d
    assert x.shape == (B, 2, S)
    assert E == H, "process LSTM feeds its own query back, so emb_size must equal hidden"
    assert max(E, D, 1) <= 4 * H
    if matmul_dtype != jnp.float32:
        # packed-dtype sublane slicing in the weight packs needs 16-row alignment
        assert H % 16 == 0 and E % 16 == 0

    def round_up(a, m):
        return (a + m - 1) // m * m

    # Batch tiling: pad to a sublane multiple; lane-dense output blocks (1, TB).
    Bp = round_up(B, 8)
    if Bp > 128:
        TB = 128
        Bp = round_up(B, TB)
    else:
        TB = Bp
    grid = (Bp // TB,)

    # ---- input: time-major [S, Bp, 2] ----
    xt = jnp.transpose(x.astype(f32), (2, 0, 1))               # (S, B, 2)
    xt = jnp.pad(xt, ((0, 0), (0, Bp - B), (0, 0)))            # (S, Bp, 2)

    # ---- pack parameters (matmul weights pre-transposed; process weights fused) ----
    w4 = jnp.concatenate(
        [params["wih_e"].T, params["whh_e"].T,
         params["wih_p"].T, params["whh_p"].T], axis=0).astype(matmul_dtype)   # (2(E+H), 4H)
    wh = jnp.concatenate([params["wq"].T, params["wr"].T],
                         axis=0).astype(matmul_dtype)                          # (2H, H)
    wd = params["w1"].T.astype(matmul_dtype)                                   # (H, D)

    W = 4 * H

    def row(v):
        v = jnp.asarray(v, f32).reshape(-1)
        return jnp.pad(v, (0, W - v.shape[0]))[None, :]

    vec = jnp.concatenate([
        row(params["bih_e"] + params["bhh_e"]),   # 0: be
        row(params["bih_p"] + params["bhh_p"]),   # 1: bp
        row(params["bq"]),                        # 2
        row(params["br"]),                        # 3
        row(params["v"]),                         # 4
        row(params["psi"]),                       # 5
        row(params["b1"]),                        # 6
        row(params["b2"]),                        # 7
        row(params["emb"][0]),                    # 8
        row(params["emb"][1]),                    # 9
        row(params["w2"][0]),                     # 10
    ], axis=0)                                    # (11, 4H) f32

    enc_unroll = True if S <= 16 else (8 if S % 8 == 0 else 1)
    kernel = make_critic_kernel(S, TB, E, H, D, n_glimpses, matmul_dtype, enc_unroll)

    in_specs = [
        pl.BlockSpec((S, TB, 2), lambda i: (0, i, 0)),   # batch-tiled input
        pl.BlockSpec(w4.shape, lambda i: (0, 0)),        # resident weight packs
        pl.BlockSpec(wh.shape, lambda i: (0, 0)),
        pl.BlockSpec(wd.shape, lambda i: (0, 0)),
        pl.BlockSpec(vec.shape, lambda i: (0, 0)),
    ]
    out_specs = pl.BlockSpec((1, TB), lambda i: (0, i))  # lane-dense output

    out2d = pl.pallas_call(
        kernel,
        out_shape=jax.ShapeDtypeStruct((1, Bp), f32),
        grid=grid,
        in_specs=in_specs,
        out_specs=out_specs,
        scratch_shapes=[
            pltpu.VMEM((S, TB, 4 * H), f32),   # hoisted encoder input-gate projections
            pltpu.VMEM((S, TB, H), f32),       # encoder outputs (time-major)
        ],
        compiler_params=pltpu.CompilerParams(dimension_semantics=("parallel",)),
    )(xt, w4, wh, wd, vec)

    return out2d[0, :B].reshape(B, 1)


def critic_net_reference(x, params, *, seq_len, emb_size, hidden, d, n_glimpses=1):
    """Plain-JAX reference with identical math (for a correctness check)."""
    B = x.shape[0]
    H, E, S, D = hidden, emb_size, seq_len, d
    emb = params["emb"]
    embedded = jnp.einsum("bks,ke->bse", x, emb)

    def lstm_step(x_t, h, c, wih, whh, b):
        gates = x_t @ wih.T + h @ whh.T + b
        i = jax.nn.sigmoid(gates[:, :H])
        f = jax.nn.sigmoid(gates[:, H:2 * H])
        g = jnp.tanh(gates[:, 2 * H:3 * H])
        o = jax.nn.sigmoid(gates[:, 3 * H:])
        c = f * c + i * g
        h = o * jnp.tanh(c)
        return h, c

    be = params["bih_e"] + params["bhh_e"]
    bp = params["bih_p"] + params["bhh_p"]
    h = jnp.zeros((B, H), jnp.float32)
    c = jnp.zeros((B, H), jnp.float32)
    outs = []
    for t in range(S):
        h, c = lstm_step(embedded[:, t, :], h, c, params["wih_e"], params["whh_e"], be)
        outs.append(h)
    enc = jnp.stack(outs, axis=1)                                        # [B, S, H]

    refp = jnp.einsum("bsi,oi->bso", enc, params["wr"]) + params["br"]   # [B, S, H]
    proc_in = jnp.broadcast_to(params["psi"][None, :], (B, E))
    for _ in range(3):
        h, c = lstm_step(proc_in, h, c, params["wih_p"], params["whh_p"], bp)
        query = h
        for _ in range(n_glimpses):
            q = query @ params["wq"].T + params["bq"]
            t_act = jnp.tanh(q[:, None, :] + refp)
            logits = jnp.einsum("bsh,h->bs", t_act, params["v"])
            probs = jax.nn.softmax(logits, axis=1)
            query = jnp.einsum("bsh,bs->bh", refp, probs)
        proc_in = query

    d1 = jax.nn.relu(proc_in @ params["w1"].T + params["b1"])
    return d1 @ params["w2"].T + params["b2"]                            # [B, 1]


def init_params(key, emb_size, hidden, d):
    """Deterministic synthetic parameters matching the PyTorch module's shapes."""
    E, H, D = emb_size, hidden, d
    ks = jax.random.split(key, 19)

    def unif(k, shape, bound):
        return jax.random.uniform(k, shape, jnp.float32, -bound, bound)

    bh = 1.0 / math.sqrt(H)
    be = 1.0 / math.sqrt(E)
    bd = 1.0 / math.sqrt(D)
    return {
        # GraphEmbedding(2, E)
        "emb": unif(ks[0], (2, E), be),
        # encoder LSTM(E -> H)
        "wih_e": unif(ks[1], (4 * H, E), bh),
        "whh_e": unif(ks[2], (4 * H, H), bh),
        "bih_e": unif(ks[3], (4 * H,), bh),
        "bhh_e": unif(ks[4], (4 * H,), bh),
        # process LSTM(E -> H)
        "wih_p": unif(ks[5], (4 * H, E), bh),
        "whh_p": unif(ks[6], (4 * H, H), bh),
        "bih_p": unif(ks[7], (4 * H,), bh),
        "bhh_p": unif(ks[8], (4 * H,), bh),
        # Bahdanau attention
        "wq": unif(ks[9], (H, H), bh),       # W_query (Linear H->H)
        "bq": unif(ks[10], (H,), bh),
        "wr": unif(ks[11], (H, H), bh),      # W_ref (Conv1d H->H, k=1), kernel dim squeezed
        "br": unif(ks[12], (H,), bh),
        "v": unif(ks[13], (H,), bh),
        # process start input
        "psi": unif(ks[14], (E,), be),
        # decoder head
        "w1": unif(ks[15], (D, H), bh),
        "b1": unif(ks[16], (D,), bh),
        "w2": unif(ks[17], (1, D), bd),
        "b2": unif(ks[18], (1,), bd),
    }


if __name__ == "__main__":
    B, S = 2, 8
    E = H = 32          # embedding_size == hidden_size (as in the original constants)
    D = 32              # decoder hidden width d
    N_GLIMPSES = 1

    key = jax.random.PRNGKey(0)
    kx, kp = jax.random.split(key)
    x = jax.random.uniform(kx, (B, 2, S), jnp.float32)          # [batch, 2, seq_len]
    params = init_params(kp, E, H, D)

    ref = critic_net_reference(x, params, seq_len=S, emb_size=E, hidden=H,
                               d=D, n_glimpses=N_GLIMPSES)

    # f32 matmul path (bit-tight against the plain-JAX reference).
    out = critic_net_forward(x, params, seq_len=S, emb_size=E, hidden=H,
                             d=D, n_glimpses=N_GLIMPSES, matmul_dtype=jnp.float32)
    out = jax.block_until_ready(out)
    assert out.shape == (B, 1), out.shape
    if not jnp.allclose(out, ref, rtol=1e-3, atol=1e-3):
        raise AssertionError(f"f32 mismatch: pallas={out} ref={ref}")

    # bf16 matmul operands (recommended on v6e/v7x): f32 accumulation + f32 elementwise.
    out_bf16 = critic_net_forward(x, params, seq_len=S, emb_size=E, hidden=H,
                                  d=D, n_glimpses=N_GLIMPSES, matmul_dtype=jnp.bfloat16)
    out_bf16 = jax.block_until_ready(out_bf16)
    if not (jnp.all(jnp.isfinite(out_bf16))
            and jnp.allclose(out_bf16, ref, rtol=1e-1, atol=1e-1)):
        raise AssertionError(f"bf16 mismatch: pallas={out_bf16} ref={ref}")

    print("KERNEL_OK")
</pallas_src>

<mosaic_0001>
module attributes {stable_mosaic.version = 11 : i64} {
  func.func @kernel(%arg0: i32, %arg1: memref<8x8x2xf32, #tpu.memory_space<vmem>>, %arg2: memref<128x128xf32, #tpu.memory_space<vmem>>, %arg3: memref<64x32xf32, #tpu.memory_space<vmem>>, %arg4: memref<32x32xf32, #tpu.memory_space<vmem>>, %arg5: memref<11x128xf32, #tpu.memory_space<vmem>>, %arg6: memref<1x8xf32, #tpu.memory_space<vmem>>, %arg7: memref<8x8x128xf32, #tpu.memory_space<vmem>>, %arg8: memref<8x8x32xf32, #tpu.memory_space<vmem>>) attributes {dimension_semantics = [#tpu.dimension_semantics<parallel>], iteration_bounds = array<i64: 1>, scalar_prefetch = 0 : i64, scratch_operands = 2 : i64, tpu.core_type = #tpu.core_type<tc>, window_params = [{transform_indices = @transform_0, window_bounds = array<i64: 8, 8, 2>}, {pipeline_mode = #tpu.pipeline_mode<synchronous>, transform_indices = @transform_1, window_bounds = array<i64: 128, 128>}, {pipeline_mode = #tpu.pipeline_mode<synchronous>, transform_indices = @transform_2, window_bounds = array<i64: 64, 32>}, {pipeline_mode = #tpu.pipeline_mode<synchronous>, transform_indices = @transform_3, window_bounds = array<i64: 32, 32>}, {pipeline_mode = #tpu.pipeline_mode<synchronous>, transform_indices = @transform_4, window_bounds = array<i64: 11, 128>}, {transform_indices = @transform_5, window_bounds = array<i64: 1, 8>}]} {
    %c0 = arith.constant 0 : index
    %c0_0 = arith.constant 0 : index
    %0 = vector.load %arg2[%c0, %c0_0] : memref<128x128xf32, #tpu.memory_space<vmem>>, vector<32x128xf32>
    %c32 = arith.constant 32 : index
    %c0_1 = arith.constant 0 : index
    %1 = vector.load %arg2[%c32, %c0_1] : memref<128x128xf32, #tpu.memory_space<vmem>>, vector<32x128xf32>
    %c64 = arith.constant 64 : index
    %c0_2 = arith.constant 0 : index
    %2 = vector.load %arg2[%c64, %c0_2] : memref<128x128xf32, #tpu.memory_space<vmem>>, vector<64x128xf32>
    %c0_3 = arith.constant 0 : index
    %c0_4 = arith.constant 0 : index
    %3 = vector.load %arg3[%c0_3, %c0_4] : memref<64x32xf32, #tpu.memory_space<vmem>>, vector<32x32xf32>
    %c32_5 = arith.constant 32 : index
    %c0_6 = arith.constant 0 : index
    %4 = vector.load %arg3[%c32_5, %c0_6] : memref<64x32xf32, #tpu.memory_space<vmem>>, vector<32x32xf32>
    %c0_7 = arith.constant 0 : index
    %c0_8 = arith.constant 0 : index
    %5 = vector.load %arg4[%c0_7, %c0_8] : memref<32x32xf32, #tpu.memory_space<vmem>>, vector<32x32xf32>
    %c0_9 = arith.constant 0 : index
    %c0_10 = arith.constant 0 : index
    %6 = vector.load %arg5[%c0_9, %c0_10] : memref<11x128xf32, #tpu.memory_space<vmem>>, vector<1x128xf32>
    %c1 = arith.constant 1 : index
    %c0_11 = arith.constant 0 : index
    %7 = vector.load %arg5[%c1, %c0_11] : memref<11x128xf32, #tpu.memory_space<vmem>>, vector<1x128xf32>
    %c2 = arith.constant 2 : index
    %c0_12 = arith.constant 0 : index
    %8 = vector.load %arg5[%c2, %c0_12] : memref<11x128xf32, #tpu.memory_space<vmem>>, vector<1x32xf32>
    %c3 = arith.constant 3 : index
    %c0_13 = arith.constant 0 : index
    %9 = vector.load %arg5[%c3, %c0_13] : memref<11x128xf32, #tpu.memory_space<vmem>>, vector<1x32xf32>
    %c4 = arith.constant 4 : index
    %c0_14 = arith.constant 0 : index
    %10 = vector.load %arg5[%c4, %c0_14] : memref<11x128xf32, #tpu.memory_space<vmem>>, vector<1x32xf32>
    %c5 = arith.constant 5 : index
    %c0_15 = arith.constant 0 : index
    %11 = vector.load %arg5[%c5, %c0_15] : memref<11x128xf32, #tpu.memory_space<vmem>>, vector<1x32xf32>
    %c6 = arith.constant 6 : index
    %c0_16 = arith.constant 0 : index
    %12 = vector.load %arg5[%c6, %c0_16] : memref<11x128xf32, #tpu.memory_space<vmem>>, vector<1x32xf32>
    %c7 = arith.constant 7 : index
    %c0_17 = arith.constant 0 : index
    %13 = vector.load %arg5[%c7, %c0_17] : memref<11x128xf32, #tpu.memory_space<vmem>>, vector<1x1xf32>
    %c8 = arith.constant 8 : index
    %c0_18 = arith.constant 0 : index
    %14 = vector.load %arg5[%c8, %c0_18] : memref<11x128xf32, #tpu.memory_space<vmem>>, vector<2x32xf32>
    %c10 = arith.constant 10 : index
    %c0_19 = arith.constant 0 : index
    %15 = vector.load %arg5[%c10, %c0_19] : memref<11x128xf32, #tpu.memory_space<vmem>>, vector<1x32xf32>
    %c0_20 = arith.constant 0 : index
    %c0_21 = arith.constant 0 : index
    %c0_22 = arith.constant 0 : index
    %16 = vector.load %arg1[%c0_20, %c0_21, %c0_22] : memref<8x8x2xf32, #tpu.memory_space<vmem>>, vector<8x8x2xf32>
    %17 = vector.shape_cast %16 : vector<8x8x2xf32> to vector<64x2xf32>
    %cst = arith.constant dense<0.000000e+00> : vector<64x32xf32>
    %18 = tpu.matmul %17, %14, %cst {dimension_numbers = #tpu.dot_dimension_numbers<[1], [0], [0], [1], [0, 0, 1, 1], [], []>} : vector<64x2xf32>, vector<2x32xf32>, vector<64x32xf32> -> vector<64x32xf32>
    %cst_23 = arith.constant dense<0.000000e+00> : vector<64x128xf32>
    %19 = tpu.matmul %18, %0, %cst_23 {dimension_numbers = #tpu.dot_dimension_numbers<[1], [0], [0], [1], [0, 0, 1, 1], [], []>} : vector<64x32xf32>, vector<32x128xf32>, vector<64x128xf32> -> vector<64x128xf32>
    %20 = vector.broadcast %6 : vector<1x128xf32> to vector<64x128xf32>
    %21 = arith.addf %19, %20 : vector<64x128xf32>
    %22 = vector.shape_cast %21 : vector<64x128xf32> to vector<8x8x128xf32>
    %c0_24 = arith.constant 0 : index
    %c0_25 = arith.constant 0 : index
    %c0_26 = arith.constant 0 : index
    %23 = vector.load %arg7[%c0_24, %c0_25, %c0_26] : memref<8x8x128xf32, #tpu.memory_space<vmem>>, vector<8x8x128xf32>
    tpu.vector_store %arg7[%c0_24, %c0_25, %c0_26], %22 {strides = array<i32>} : memref<8x8x128xf32, #tpu.memory_space<vmem>>, vector<8x8x128xf32>,
    %cst_27 = arith.constant 0.000000e+00 : f32
    %24 = vector.broadcast %cst_27 : f32 to vector<8x32xf32>
    %c0_i32 = arith.constant 0 : i32
    %25 = arith.index_cast %c0_i32 : i32 to index
    %c0_28 = arith.constant 0 : index
    %c0_29 = arith.constant 0 : index
    %26 = vector.load %arg7[%25, %c0_28, %c0_29] : memref<8x8x128xf32, #tpu.memory_space<vmem>>, vector<1x8x128xf32>
    %27 = vector.shape_cast %26 : vector<1x8x128xf32> to vector<8x128xf32>
    %cst_30 = arith.constant dense<0.000000e+00> : vector<8x128xf32>
    %28 = tpu.matmul %24, %1, %cst_30 {dimension_numbers = #tpu.dot_dimension_numbers<[1], [0], [0], [1], [0, 0, 1, 1], [], []>} : vector<8x32xf32>, vector<32x128xf32>, vector<8x128xf32> -> vector<8x128xf32>
    %29 = arith.addf %27, %28 : vector<8x128xf32>
    %30 = arith.negf %29 : vector<8x128xf32>
    %31 = math.exp %30 : vector<8x128xf32>
    %cst_31 = arith.constant 1.000000e+00 : f32
    %32 = vector.broadcast %cst_31 : f32 to vector<8x128xf32>
    %33 = arith.addf %32, %31 : vector<8x128xf32>
    %34 = arith.divf %32, %33 : vector<8x128xf32>
    %35 = math.tanh %29 : vector<8x128xf32>
    %36 = vector.extract_strided_slice %34 {offsets = [0, 0], sizes = [8, 32], strides = [1, 1]} : vector<8x128xf32> to vector<8x32xf32>
    %37 = vector.extract_strided_slice %34 {offsets = [0, 32], sizes = [8, 32], strides = [1, 1]} : vector<8x128xf32> to vector<8x32xf32>
    %38 = vector.extract_strided_slice %35 {offsets = [0, 64], sizes = [8, 32], strides = [1, 1]} : vector<8x128xf32> to vector<8x32xf32>
    %39 = vector.extract_strided_slice %34 {offsets = [0, 96], sizes = [8, 32], strides = [1, 1]} : vector<8x128xf32> to vector<8x32xf32>
    %40 = arith.mulf %37, %24 : vector<8x32xf32>
    %41 = arith.mulf %36, %38 : vector<8x32xf32>
    %42 = arith.addf %40, %41 : vector<8x32xf32>
    %43 = math.tanh %42 : vector<8x32xf32>
    %44 = arith.mulf %39, %43 : vector<8x32xf32>
    %45 = arith.index_cast %c0_i32 : i32 to index
    %c0_32 = arith.constant 0 : index
    %c0_33 = arith.constant 0 : index
    %46 = vector.load %arg8[%45, %c0_32, %c0_33] : memref<8x8x32xf32, #tpu.memory_space<vmem>>, vector<1x8x32xf32>
    %47 = vector.shape_cast %46 : vector<1x8x32xf32> to vector<8x32xf32>
    %48 = vector.shape_cast %44 : vector<8x32xf32> to vector<1x8x32xf32>
    tpu.vector_store %arg8[%45, %c0_32, %c0_33], %48 {strides = array<i32>} : memref<8x8x32xf32, #tpu.memory_space<vmem>>, vector<1x8x32xf32>,
    %c1_i32 = arith.constant 1 : i32
    %49 = arith.index_cast %c1_i32 : i32 to index
    %c0_34 = arith.constant 0 : index
    %c0_35 = arith.constant 0 : index
    %50 = vector.load %arg7[%49, %c0_34, %c0_35] : memref<8x8x128xf32, #tpu.memory_space<vmem>>, vector<1x8x128xf32>
    %51 = vector.shape_cast %50 : vector<1x8x128xf32> to vector<8x128xf32>
    %cst_36 = arith.constant dense<0.000000e+00> : vector<8x128xf32>
    %52 = tpu.matmul %44, %1, %cst_36 {dimension_numbers = #tpu.dot_dimension_numbers<[1], [0], [0], [1], [0, 0, 1, 1], [], []>} : vector<8x32xf32>, vector<32x128xf32>, vector<8x128xf32> -> vector<8x128xf32>
    %53 = arith.addf %51, %52 : vector<8x128xf32>
    %54 = arith.negf %53 : vector<8x128xf32>
    %55 = math.exp %54 : vector<8x128xf32>
    %cst_37 = arith.constant 1.000000e+00 : f32
    %56 = vector.broadcast %cst_37 : f32 to vector<8x128xf32>
    %57 = arith.addf %56, %55 : vector<8x128xf32>
    %58 = arith.divf %56, %57 : vector<8x128xf32>
    %59 = math.tanh %53 : vector<8x128xf32>
    %60 = vector.extract_strided_slice %58 {offsets = [0, 0], sizes = [8, 32], strides = [1, 1]} : vector<8x128xf32> to vector<8x32xf32>
    %61 = vector.extract_strided_slice %58 {offsets = [0, 32], sizes = [8, 32], strides = [1, 1]} : vector<8x128xf32> to vector<8x32xf32>
    %62 = vector.extract_strided_slice %59 {offsets = [0, 64], sizes = [8, 32], strides = [1, 1]} : vector<8x128xf32> to vector<8x32xf32>
    %63 = vector.extract_strided_slice %58 {offsets = [0, 96], sizes = [8, 32], strides = [1, 1]} : vector<8x128xf32> to vector<8x32xf32>
    %64 = arith.mulf %61, %42 : vector<8x32xf32>
    %65 = arith.mulf %60, %62 : vector<8x32xf32>
    %66 = arith.addf %64, %65 : vector<8x32xf32>
    %67 = math.tanh %66 : vector<8x32xf32>
    %68 = arith.mulf %63, %67 : vector<8x32xf32>
    %69 = arith.index_cast %c1_i32 : i32 to index
    %c0_38 = arith.constant 0 : index
    %c0_39 = arith.constant 0 : index
    %70 = vector.load %arg8[%69, %c0_38, %c0_39] : memref<8x8x32xf32, #tpu.memory_space<vmem>>, vector<1x8x32xf32>
    %71 = vector.shape_cast %70 : vector<1x8x32xf32> to vector<8x32xf32>
    %72 = vector.shape_cast %68 : vector<8x32xf32> to vector<1x8x32xf32>
    tpu.vector_store %arg8[%69, %c0_38, %c0_39], %72 {strides = array<i32>} : memref<8x8x32xf32, #tpu.memory_space<vmem>>, vector<1x8x32xf32>,
    %c2_i32 = arith.constant 2 : i32
    %73 = arith.index_cast %c2_i32 : i32 to index
    %c0_40 = arith.constant 0 : index
    %c0_41 = arith.constant 0 : index
    %74 = vector.load %arg7[%73, %c0_40, %c0_41] : memref<8x8x128xf32, #tpu.memory_space<vmem>>, vector<1x8x128xf32>
    %75 = vector.shape_cast %74 : vector<1x8x128xf32> to vector<8x128xf32>
    %cst_42 = arith.constant dense<0.000000e+00> : vector<8x128xf32>
    %76 = tpu.matmul %68, %1, %cst_42 {dimension_numbers = #tpu.dot_dimension_numbers<[1], [0], [0], [1], [0, 0, 1, 1], [], []>} : vector<8x32xf32>, vector<32x128xf32>, vector<8x128xf32> -> vector<8x128xf32>
    %77 = arith.addf %75, %76 : vector<8x128xf32>
    %78 = arith.negf %77 : vector<8x128xf32>
    %79 = math.exp %78 : vector<8x128xf32>
    %cst_43 = arith.constant 1.000000e+00 : f32
    %80 = vector.broadcast %cst_43 : f32 to vector<8x128xf32>
    %81 = arith.addf %80, %79 : vector<8x128xf32>
    %82 = arith.divf %80, %81 : vector<8x128xf32>
    %83 = math.tanh %77 : vector<8x128xf32>
    %84 = vector.extract_strided_slice %82 {offsets = [0, 0], sizes = [8, 32], strides = [1, 1]} : vector<8x128xf32> to vector<8x32xf32>
    %85 = vector.extract_strided_slice %82 {offsets = [0, 32], sizes = [8, 32], strides = [1, 1]} : vector<8x128xf32> to vector<8x32xf32>
    %86 = vector.extract_strided_slice %83 {offsets = [0, 64], sizes = [8, 32], strides = [1, 1]} : vector<8x128xf32> to vector<8x32xf32>
    %87 = vector.extract_strided_slice %82 {offsets = [0, 96], sizes = [8, 32], strides = [1, 1]} : vector<8x128xf32> to vector<8x32xf32>
    %88 = arith.mulf %85, %66 : vector<8x32xf32>
    %89 = arith.mulf %84, %86 : vector<8x32xf32>
    %90 = arith.addf %88, %89 : vector<8x32xf32>
    %91 = math.tanh %90 : vector<8x32xf32>
    %92 = arith.mulf %87, %91 : vector<8x32xf32>
    %93 = arith.index_cast %c2_i32 : i32 to index
    %c0_44 = arith.constant 0 : index
    %c0_45 = arith.constant 0 : index
    %94 = vector.load %arg8[%93, %c0_44, %c0_45] : memref<8x8x32xf32, #tpu.memory_space<vmem>>, vector<1x8x32xf32>
    %95 = vector.shape_cast %94 : vector<1x8x32xf32> to vector<8x32xf32>
    %96 = vector.shape_cast %92 : vector<8x32xf32> to vector<1x8x32xf32>
    tpu.vector_store %arg8[%93, %c0_44, %c0_45], %96 {strides = array<i32>} : memref<8x8x32xf32, #tpu.memory_space<vmem>>, vector<1x8x32xf32>,
    %c3_i32 = arith.constant 3 : i32
    %97 = arith.index_cast %c3_i32 : i32 to index
    %c0_46 = arith.constant 0 : index
    %c0_47 = arith.constant 0 : index
    %98 = vector.load %arg7[%97, %c0_46, %c0_47] : memref<8x8x128xf32, #tpu.memory_space<vmem>>, vector<1x8x128xf32>
    %99 = vector.shape_cast %98 : vector<1x8x128xf32> to vector<8x128xf32>
    %cst_48 = arith.constant dense<0.000000e+00> : vector<8x128xf32>
    %100 = tpu.matmul %92, %1, %cst_48 {dimension_numbers = #tpu.dot_dimension_numbers<[1], [0], [0], [1], [0, 0, 1, 1], [], []>} : vector<8x32xf32>, vector<32x128xf32>, vector<8x128xf32> -> vector<8x128xf32>
    %101 = arith.addf %99, %100 : vector<8x128xf32>
    %102 = arith.negf %101 : vector<8x128xf32>
    %103 = math.exp %102 : vector<8x128xf32>
    %cst_49 = arith.constant 1.000000e+00 : f32
    %104 = vector.broadcast %cst_49 : f32 to vector<8x128xf32>
    %105 = arith.addf %104, %103 : vector<8x128xf32>
    %106 = arith.divf %104, %105 : vector<8x128xf32>
    %107 = math.tanh %101 : vector<8x128xf32>
    %108 = vector.extract_strided_slice %106 {offsets = [0, 0], sizes = [8, 32], strides = [1, 1]} : vector<8x128xf32> to vector<8x32xf32>
    %109 = vector.extract_strided_slice %106 {offsets = [0, 32], sizes = [8, 32], strides = [1, 1]} : vector<8x128xf32> to vector<8x32xf32>
    %110 = vector.extract_strided_slice %107 {offsets = [0, 64], sizes = [8, 32], strides = [1, 1]} : vector<8x128xf32> to vector<8x32xf32>
    %111 = vector.extract_strided_slice %106 {offsets = [0, 96], sizes = [8, 32], strides = [1, 1]} : vector<8x128xf32> to vector<8x32xf32>
    %112 = arith.mulf %109, %90 : vector<8x32xf32>
    %113 = arith.mulf %108, %110 : vector<8x32xf32>
    %114 = arith.addf %112, %113 : vector<8x32xf32>
    %115 = math.tanh %114 : vector<8x32xf32>
    %116 = arith.mulf %111, %115 : vector<8x32xf32>
    %117 = arith.index_cast %c3_i32 : i32 to index
    %c0_50 = arith.constant 0 : index
    %c0_51 = arith.constant 0 : index
    %118 = vector.load %arg8[%117, %c0_50, %c0_51] : memref<8x8x32xf32, #tpu.memory_space<vmem>>, vector<1x8x32xf32>
    %119 = vector.shape_cast %118 : vector<1x8x32xf32> to vector<8x32xf32>
    %120 = vector.shape_cast %116 : vector<8x32xf32> to vector<1x8x32xf32>
    tpu.vector_store %arg8[%117, %c0_50, %c0_51], %120 {strides = array<i32>} : memref<8x8x32xf32, #tpu.memory_space<vmem>>, vector<1x8x32xf32>,
    %c4_i32 = arith.constant 4 : i32
    %121 = arith.index_cast %c4_i32 : i32 to index
    %c0_52 = arith.constant 0 : index
    %c0_53 = arith.constant 0 : index
    %122 = vector.load %arg7[%121, %c0_52, %c0_53] : memref<8x8x128xf32, #tpu.memory_space<vmem>>, vector<1x8x128xf32>
    %123 = vector.shape_cast %122 : vector<1x8x128xf32> to vector<8x128xf32>
    %cst_54 = arith.constant dense<0.000000e+00> : vector<8x128xf32>
    %124 = tpu.matmul %116, %1, %cst_54 {dimension_numbers = #tpu.dot_dimension_numbers<[1], [0], [0], [1], [0, 0, 1, 1], [], []>} : vector<8x32xf32>, vector<32x128xf32>, vector<8x128xf32> -> vector<8x128xf32>
    %125 = arith.addf %123, %124 : vector<8x128xf32>
    %126 = arith.negf %125 : vector<8x128xf32>
    %127 = math.exp %126 : vector<8x128xf32>
    %cst_55 = arith.constant 1.000000e+00 : f32
    %128 = vector.broadcast %cst_55 : f32 to vector<8x128xf32>
    %129 = arith.addf %128, %127 : vector<8x128xf32>
    %130 = arith.divf %128, %129 : vector<8x128xf32>
    %131 = math.tanh %125 : vector<8x128xf32>
    %132 = vector.extract_strided_slice %130 {offsets = [0, 0], sizes = [8, 32], strides = [1, 1]} : vector<8x128xf32> to vector<8x32xf32>
    %133 = vector.extract_strided_slice %130 {offsets = [0, 32], sizes = [8, 32], strides = [1, 1]} : vector<8x128xf32> to vector<8x32xf32>
    %134 = vector.extract_strided_slice %131 {offsets = [0, 64], sizes = [8, 32], strides = [1, 1]} : vector<8x128xf32> to vector<8x32xf32>
    %135 = vector.extract_strided_slice %130 {offsets = [0, 96], sizes = [8, 32], strides = [1, 1]} : vector<8x128xf32> to vector<8x32xf32>
    %136 = arith.mulf %133, %114 : vector<8x32xf32>
    %137 = arith.mulf %132, %134 : vector<8x32xf32>
    %138 = arith.addf %136, %137 : vector<8x32xf32>
    %139 = math.tanh %138 : vector<8x32xf32>
    %140 = arith.mulf %135, %139 : vector<8x32xf32>
    %141 = arith.index_cast %c4_i32 : i32 to index
    %c0_56 = arith.constant 0 : index
    %c0_57 = arith.constant 0 : index
    %142 = vector.load %arg8[%141, %c0_56, %c0_57] : memref<8x8x32xf32, #tpu.memory_space<vmem>>, vector<1x8x32xf32>
    %143 = vector.shape_cast %142 : vector<1x8x32xf32> to vector<8x32xf32>
    %144 = vector.shape_cast %140 : vector<8x32xf32> to vector<1x8x32xf32>
    tpu.vector_store %arg8[%141, %c0_56, %c0_57], %144 {strides = array<i32>} : memref<8x8x32xf32, #tpu.memory_space<vmem>>, vector<1x8x32xf32>,
    %c5_i32 = arith.constant 5 : i32
    %145 = arith.index_cast %c5_i32 : i32 to index
    %c0_58 = arith.constant 0 : index
    %c0_59 = arith.constant 0 : index
    %146 = vector.load %arg7[%145, %c0_58, %c0_59] : memref<8x8x128xf32, #tpu.memory_space<vmem>>, vector<1x8x128xf32>
    %147 = vector.shape_cast %146 : vector<1x8x128xf32> to vector<8x128xf32>
    %cst_60 = arith.constant dense<0.000000e+00> : vector<8x128xf32>
    %148 = tpu.matmul %140, %1, %cst_60 {dimension_numbers = #tpu.dot_dimension_numbers<[1], [0], [0], [1], [0, 0, 1, 1], [], []>} : vector<8x32xf32>, vector<32x128xf32>, vector<8x128xf32> -> vector<8x128xf32>
    %149 = arith.addf %147, %148 : vector<8x128xf32>
    %150 = arith.negf %149 : vector<8x128xf32>
    %151 = math.exp %150 : vector<8x128xf32>
    %cst_61 = arith.constant 1.000000e+00 : f32
    %152 = vector.broadcast %cst_61 : f32 to vector<8x128xf32>
    %153 = arith.addf %152, %151 : vector<8x128xf32>
    %154 = arith.divf %152, %153 : vector<8x128xf32>
    %155 = math.tanh %149 : vector<8x128xf32>
    %156 = vector.extract_strided_slice %154 {offsets = [0, 0], sizes = [8, 32], strides = [1, 1]} : vector<8x128xf32> to vector<8x32xf32>
    %157 = vector.extract_strided_slice %154 {offsets = [0, 32], sizes = [8, 32], strides = [1, 1]} : vector<8x128xf32> to vector<8x32xf32>
    %158 = vector.extract_strided_slice %155 {offsets = [0, 64], sizes = [8, 32], strides = [1, 1]} : vector<8x128xf32> to vector<8x32xf32>
    %159 = vector.extract_strided_slice %154 {offsets = [0, 96], sizes = [8, 32], strides = [1, 1]} : vector<8x128xf32> to vector<8x32xf32>
    %160 = arith.mulf %157, %138 : vector<8x32xf32>
    %161 = arith.mulf %156, %158 : vector<8x32xf32>
    %162 = arith.addf %160, %161 : vector<8x32xf32>
    %163 = math.tanh %162 : vector<8x32xf32>
    %164 = arith.mulf %159, %163 : vector<8x32xf32>
    %165 = arith.index_cast %c5_i32 : i32 to index
    %c0_62 = arith.constant 0 : index
    %c0_63 = arith.constant 0 : index
    %166 = vector.load %arg8[%165, %c0_62, %c0_63] : memref<8x8x32xf32, #tpu.memory_space<vmem>>, vector<1x8x32xf32>
    %167 = vector.shape_cast %166 : vector<1x8x32xf32> to vector<8x32xf32>
    %168 = vector.shape_cast %164 : vector<8x32xf32> to vector<1x8x32xf32>
    tpu.vector_store %arg8[%165, %c0_62, %c0_63], %168 {strides = array<i32>} : memref<8x8x32xf32, #tpu.memory_space<vmem>>, vector<1x8x32xf32>,
    %c6_i32 = arith.constant 6 : i32
    %169 = arith.index_cast %c6_i32 : i32 to index
    %c0_64 = arith.constant 0 : index
    %c0_65 = arith.constant 0 : index
    %170 = vector.load %arg7[%169, %c0_64, %c0_65] : memref<8x8x128xf32, #tpu.memory_space<vmem>>, vector<1x8x128xf32>
    %171 = vector.shape_cast %170 : vector<1x8x128xf32> to vector<8x128xf32>
    %cst_66 = arith.constant dense<0.000000e+00> : vector<8x128xf32>
    %172 = tpu.matmul %164, %1, %cst_66 {dimension_numbers = #tpu.dot_dimension_numbers<[1], [0], [0], [1], [0, 0, 1, 1], [], []>} : vector<8x32xf32>, vector<32x128xf32>, vector<8x128xf32> -> vector<8x128xf32>
    %173 = arith.addf %171, %172 : vector<8x128xf32>
    %174 = arith.negf %173 : vector<8x128xf32>
    %175 = math.exp %174 : vector<8x128xf32>
    %cst_67 = arith.constant 1.000000e+00 : f32
    %176 = vector.broadcast %cst_67 : f32 to vector<8x128xf32>
    %177 = arith.addf %176, %175 : vector<8x128xf32>
    %178 = arith.divf %176, %177 : vector<8x128xf32>
    %179 = math.tanh %173 : vector<8x128xf32>
    %180 = vector.extract_strided_slice %178 {offsets = [0, 0], sizes = [8, 32], strides = [1, 1]} : vector<8x128xf32> to vector<8x32xf32>
    %181 = vector.extract_strided_slice %178 {offsets = [0, 32], sizes = [8, 32], strides = [1, 1]} : vector<8x128xf32> to vector<8x32xf32>
    %182 = vector.extract_strided_slice %179 {offsets = [0, 64], sizes = [8, 32], strides = [1, 1]} : vector<8x128xf32> to vector<8x32xf32>
    %183 = vector.extract_strided_slice %178 {offsets = [0, 96], sizes = [8, 32], strides = [1, 1]} : vector<8x128xf32> to vector<8x32xf32>
    %184 = arith.mulf %181, %162 : vector<8x32xf32>
    %185 = arith.mulf %180, %182 : vector<8x32xf32>
    %186 = arith.addf %184, %185 : vector<8x32xf32>
    %187 = math.tanh %186 : vector<8x32xf32>
    %188 = arith.mulf %183, %187 : vector<8x32xf32>
    %189 = arith.index_cast %c6_i32 : i32 to index
    %c0_68 = arith.constant 0 : index
    %c0_69 = arith.constant 0 : index
    %190 = vector.load %arg8[%189, %c0_68, %c0_69] : memref<8x8x32xf32, #tpu.memory_space<vmem>>, vector<1x8x32xf32>
    %191 = vector.shape_cast %190 : vector<1x8x32xf32> to vector<8x32xf32>
    %192 = vector.shape_cast %188 : vector<8x32xf32> to vector<1x8x32xf32>
    tpu.vector_store %arg8[%189, %c0_68, %c0_69], %192 {strides = array<i32>} : memref<8x8x32xf32, #tpu.memory_space<vmem>>, vector<1x8x32xf32>,
    %c7_i32 = arith.constant 7 : i32
    %193 = arith.index_cast %c7_i32 : i32 to index
    %c0_70 = arith.constant 0 : index
    %c0_71 = arith.constant 0 : index
    %194 = vector.load %arg7[%193, %c0_70, %c0_71] : memref<8x8x128xf32, #tpu.memory_space<vmem>>, vector<1x8x128xf32>
    %195 = vector.shape_cast %194 : vector<1x8x128xf32> to vector<8x128xf32>
    %cst_72 = arith.constant dense<0.000000e+00> : vector<8x128xf32>
    %196 = tpu.matmul %188, %1, %cst_72 {dimension_numbers = #tpu.dot_dimension_numbers<[1], [0], [0], [1], [0, 0, 1, 1], [], []>} : vector<8x32xf32>, vector<32x128xf32>, vector<8x128xf32> -> vector<8x128xf32>
    %197 = arith.addf %195, %196 : vector<8x128xf32>
    %198 = arith.negf %197 : vector<8x128xf32>
    %199 = math.exp %198 : vector<8x128xf32>
    %cst_73 = arith.constant 1.000000e+00 : f32
    %200 = vector.broadcast %cst_73 : f32 to vector<8x128xf32>
    %201 = arith.addf %200, %199 : vector<8x128xf32>
    %202 = arith.divf %200, %201 : vector<8x128xf32>
    %203 = math.tanh %197 : vector<8x128xf32>
    %204 = vector.extract_strided_slice %202 {offsets = [0, 0], sizes = [8, 32], strides = [1, 1]} : vector<8x128xf32> to vector<8x32xf32>
    %205 = vector.extract_strided_slice %202 {offsets = [0, 32], sizes = [8, 32], strides = [1, 1]} : vector<8x128xf32> to vector<8x32xf32>
    %206 = vector.extract_strided_slice %203 {offsets = [0, 64], sizes = [8, 32], strides = [1, 1]} : vector<8x128xf32> to vector<8x32xf32>
    %207 = vector.extract_strided_slice %202 {offsets = [0, 96], sizes = [8, 32], strides = [1, 1]} : vector<8x128xf32> to vector<8x32xf32>
    %208 = arith.mulf %205, %186 : vector<8x32xf32>
    %209 = arith.mulf %204, %206 : vector<8x32xf32>
    %210 = arith.addf %208, %209 : vector<8x32xf32>
    %211 = math.tanh %210 : vector<8x32xf32>
    %212 = arith.mulf %207, %211 : vector<8x32xf32>
    %213 = arith.index_cast %c7_i32 : i32 to index
    %c0_74 = arith.constant 0 : index
    %c0_75 = arith.constant 0 : index
    %214 = vector.load %arg8[%213, %c0_74, %c0_75] : memref<8x8x32xf32, #tpu.memory_space<vmem>>, vector<1x8x32xf32>
    %215 = vector.shape_cast %214 : vector<1x8x32xf32> to vector<8x32xf32>
    %216 = vector.shape_cast %212 : vector<8x32xf32> to vector<1x8x32xf32>
    tpu.vector_store %arg8[%213, %c0_74, %c0_75], %216 {strides = array<i32>} : memref<8x8x32xf32, #tpu.memory_space<vmem>>, vector<1x8x32xf32>,
    %c8_i32 = arith.constant 8 : i32
    %c0_76 = arith.constant 0 : index
    %c0_77 = arith.constant 0 : index
    %c0_78 = arith.constant 0 : index
    %217 = vector.load %arg8[%c0_76, %c0_77, %c0_78] : memref<8x8x32xf32, #tpu.memory_space<vmem>>, vector<8x8x32xf32>
    %218 = vector.shape_cast %217 : vector<8x8x32xf32> to vector<64x32xf32>
    %cst_79 = arith.constant dense<0.000000e+00> : vector<64x32xf32>
    %219 = tpu.matmul %218, %4, %cst_79 {dimension_numbers = #tpu.dot_dimension_numbers<[1], [0], [0], [1], [0, 0, 1, 1], [], []>} : vector<64x32xf32>, vector<32x32xf32>, vector<64x32xf32> -> vector<64x32xf32>
    %220 = vector.broadcast %9 : vector<1x32xf32> to vector<64x32xf32>
    %221 = arith.addf %219, %220 : vector<64x32xf32>
    %222 = vector.shape_cast %221 : vector<64x32xf32> to vector<8x8x32xf32>
    %223 = vector.shape_cast %11 : vector<1x32xf32> to vector<1x32xf32>
    %224 = vector.broadcast %223 : vector<1x32xf32> to vector<8x32xf32>
    %225 = tpu.concatenate %224, %212 in 1 : vector<8x32xf32>, vector<8x32xf32> -> vector<8x64xf32>
    %cst_80 = arith.constant dense<0.000000e+00> : vector<8x128xf32>
    %226 = tpu.matmul %225, %2, %cst_80 {dimension_numbers = #tpu.dot_dimension_numbers<[1], [0], [0], [1], [0, 0, 1, 1], [], []>} : vector<8x64xf32>, vector<64x128xf32>, vector<8x128xf32> -> vector<8x128xf32>
    %227 = vector.broadcast %7 : vector<1x128xf32> to vector<8x128xf32>
    %228 = arith.addf %226, %227 : vector<8x128xf32>
    %229 = arith.negf %228 : vector<8x128xf32>
    %230 = math.exp %229 : vector<8x128xf32>
    %cst_81 = arith.constant 1.000000e+00 : f32
    %231 = vector.broadcast %cst_81 : f32 to vector<8x128xf32>
    %232 = arith.addf %231, %230 : vector<8x128xf32>
    %233 = arith.divf %231, %232 : vector<8x128xf32>
    %234 = math.tanh %228 : vector<8x128xf32>
    %235 = vector.extract_strided_slice %233 {offsets = [0, 0], sizes = [8, 32], strides = [1, 1]} : vector<8x128xf32> to vector<8x32xf32>
    %236 = vector.extract_strided_slice %233 {offsets = [0, 32], sizes = [8, 32], strides = [1, 1]} : vector<8x128xf32> to vector<8x32xf32>
    %237 = vector.extract_strided_slice %234 {offsets = [0, 64], sizes = [8, 32], strides = [1, 1]} : vector<8x128xf32> to vector<8x32xf32>
    %238 = vector.extract_strided_slice %233 {offsets = [0, 96], sizes = [8, 32], strides = [1, 1]} : vector<8x128xf32> to vector<8x32xf32>
    %239 = arith.mulf %236, %210 : vector<8x32xf32>
    %240 = arith.mulf %235, %237 : vector<8x32xf32>
    %241 = arith.addf %239, %240 : vector<8x32xf32>
    %242 = math.tanh %241 : vector<8x32xf32>
    %243 = arith.mulf %238, %242 : vector<8x32xf32>
    %cst_82 = arith.constant dense<0.000000e+00> : vector<8x32xf32>
    %244 = tpu.matmul %243, %3, %cst_82 {dimension_numbers = #tpu.dot_dimension_numbers<[1], [0], [0], [1], [0, 0, 1, 1], [], []>} : vector<8x32xf32>, vector<32x32xf32>, vector<8x32xf32> -> vector<8x32xf32>
    %245 = vector.broadcast %8 : vector<1x32xf32> to vector<8x32xf32>
    %246 = arith.addf %244, %245 : vector<8x32xf32>
    %247 = vector.shape_cast %246 : vector<8x32xf32> to vector<1x8x32xf32>
    %248 = vector.broadcast %247 : vector<1x8x32xf32> to vector<8x8x32xf32>
    %249 = arith.addf %222, %248 : vector<8x8x32xf32>
    %250 = math.tanh %249 : vector<8x8x32xf32>
    %251 = vector.shape_cast %250 : vector<8x8x32xf32> to vector<64x32xf32>
    %cst_83 = arith.constant dense<0.000000e+00> : vector<64x1xf32>
    %252 = tpu.matmul %251, %10, %cst_83 {dimension_numbers = #tpu.dot_dimension_numbers<[1], [1], [0], [0], [0, 0, 1, 0], [], []>} : vector<64x32xf32>, vector<1x32xf32>, vector<64x1xf32> -> vector<64x1xf32>
    %253 = vector.shape_cast %252 : vector<64x1xf32> to vector<8x8x1xf32>
    %cst_84 = arith.constant dense<0xFF800000> : vector<8x1xf32>
    %254 = vector.multi_reduction <maximumf>, %253, %cst_84 [0] : vector<8x8x1xf32> to vector<8x1xf32>
    %255 = vector.shape_cast %254 : vector<8x1xf32> to vector<1x8x1xf32>
    %256 = vector.broadcast %255 : vector<1x8x1xf32> to vector<8x8x1xf32>
    %257 = arith.subf %253, %256 : vector<8x8x1xf32>
    %258 = math.exp %257 : vector<8x8x1xf32>
    %cst_85 = arith.constant dense<0.000000e+00> : vector<8x1xf32>
    %259 = vector.multi_reduction <add>, %258, %cst_85 [0] : vector<8x8x1xf32> to vector<8x1xf32>
    %260 = vector.shape_cast %259 : vector<8x1xf32> to vector<1x8x1xf32>
    %261 = vector.broadcast %260 : vector<1x8x1xf32> to vector<8x8x1xf32>
    %262 = arith.divf %258, %261 : vector<8x8x1xf32>
    %263 = vector.broadcast %262 : vector<8x8x1xf32> to vector<8x8x32xf32>
    %264 = arith.mulf %222, %263 : vector<8x8x32xf32>
    %cst_86 = arith.constant dense<0.000000e+00> : vector<8x32xf32>
    %265 = vector.multi_reduction <add>, %264, %cst_86 [0] : vector<8x8x32xf32> to vector<8x32xf32>
    %266 = tpu.concatenate %265, %243 in 1 : vector<8x32xf32>, vector<8x32xf32> -> vector<8x64xf32>
    %cst_87 = arith.constant dense<0.000000e+00> : vector<8x128xf32>
    %267 = tpu.matmul %266, %2, %cst_87 {dimension_numbers = #tpu.dot_dimension_numbers<[1], [0], [0], [1], [0, 0, 1, 1], [], []>} : vector<8x64xf32>, vector<64x128xf32>, vector<8x128xf32> -> vector<8x128xf32>
    %268 = vector.broadcast %7 : vector<1x128xf32> to vector<8x128xf32>
    %269 = arith.addf %267, %268 : vector<8x128xf32>
    %270 = arith.negf %269 : vector<8x128xf32>
    %271 = math.exp %270 : vector<8x128xf32>
    %cst_88 = arith.constant 1.000000e+00 : f32
    %272 = vector.broadcast %cst_88 : f32 to vector<8x128xf32>
    %273 = arith.addf %272, %271 : vector<8x128xf32>
    %274 = arith.divf %272, %273 : vector<8x128xf32>
    %275 = math.tanh %269 : vector<8x128xf32>
    %276 = vector.extract_strided_slice %274 {offsets = [0, 0], sizes = [8, 32], strides = [1, 1]} : vector<8x128xf32> to vector<8x32xf32>
    %277 = vector.extract_strided_slice %274 {offsets = [0, 32], sizes = [8, 32], strides = [1, 1]} : vector<8x128xf32> to vector<8x32xf32>
    %278 = vector.extract_strided_slice %275 {offsets = [0, 64], sizes = [8, 32], strides = [1, 1]} : vector<8x128xf32> to vector<8x32xf32>
    %279 = vector.extract_strided_slice %274 {offsets = [0, 96], sizes = [8, 32], strides = [1, 1]} : vector<8x128xf32> to vector<8x32xf32>
    %280 = arith.mulf %277, %241 : vector<8x32xf32>
    %281 = arith.mulf %276, %278 : vector<8x32xf32>
    %282 = arith.addf %280, %281 : vector<8x32xf32>
    %283 = math.tanh %282 : vector<8x32xf32>
    %284 = arith.mulf %279, %283 : vector<8x32xf32>
    %cst_89 = arith.constant dense<0.000000e+00> : vector<8x32xf32>
    %285 = tpu.matmul %284, %3, %cst_89 {dimension_numbers = #tpu.dot_dimension_numbers<[1], [0], [0], [1], [0, 0, 1, 1], [], []>} : vector<8x32xf32>, vector<32x32xf32>, vector<8x32xf32> -> vector<8x32xf32>
    %286 = vector.broadcast %8 : vector<1x32xf32> to vector<8x32xf32>
    %287 = arith.addf %285, %286 : vector<8x32xf32>
    %288 = vector.shape_cast %287 : vector<8x32xf32> to vector<1x8x32xf32>
    %289 = vector.broadcast %288 : vector<1x8x32xf32> to vector<8x8x32xf32>
    %290 = arith.addf %222, %289 : vector<8x8x32xf32>
    %291 = math.tanh %290 : vector<8x8x32xf32>
    %292 = vector.shape_cast %291 : vector<8x8x32xf32> to vector<64x32xf32>
    %cst_90 = arith.constant dense<0.000000e+00> : vector<64x1xf32>
    %293 = tpu.matmul %292, %10, %cst_90 {dimension_numbers = #tpu.dot_dimension_numbers<[1], [1], [0], [0], [0, 0, 1, 0], [], []>} : vector<64x32xf32>, vector<1x32xf32>, vector<64x1xf32> -> vector<64x1xf32>
    %294 = vector.shape_cast %293 : vector<64x1xf32> to vector<8x8x1xf32>
    %cst_91 = arith.constant dense<0xFF800000> : vector<8x1xf32>
    %295 = vector.multi_reduction <maximumf>, %294, %cst_91 [0] : vector<8x8x1xf32> to vector<8x1xf32>
    %296 = vector.shape_cast %295 : vector<8x1xf32> to vector<1x8x1xf32>
    %297 = vector.broadcast %296 : vector<1x8x1xf32> to vector<8x8x1xf32>
    %298 = arith.subf %294, %297 : vector<8x8x1xf32>
    %299 = math.exp %298 : vector<8x8x1xf32>
    %cst_92 = arith.constant dense<0.000000e+00> : vector<8x1xf32>
    %300 = vector.multi_reduction <add>, %299, %cst_92 [0] : vector<8x8x1xf32> to vector<8x1xf32>
    %301 = vector.shape_cast %300 : vector<8x1xf32> to vector<1x8x1xf32>
    %302 = vector.broadcast %301 : vector<1x8x1xf32> to vector<8x8x1xf32>
    %303 = arith.divf %299, %302 : vector<8x8x1xf32>
    %304 = vector.broadcast %303 : vector<8x8x1xf32> to vector<8x8x32xf32>
    %305 = arith.mulf %222, %304 : vector<8x8x32xf32>
    %cst_93 = arith.constant dense<0.000000e+00> : vector<8x32xf32>
    %306 = vector.multi_reduction <add>, %305, %cst_93 [0] : vector<8x8x32xf32> to vector<8x32xf32>
    %307 = tpu.concatenate %306, %284 in 1 : vector<8x32xf32>, vector<8x32xf32> -> vector<8x64xf32>
    %cst_94 = arith.constant dense<0.000000e+00> : vector<8x128xf32>
    %308 = tpu.matmul %307, %2, %cst_94 {dimension_numbers = #tpu.dot_dimension_numbers<[1], [0], [0], [1], [0, 0, 1, 1], [], []>} : vector<8x64xf32>, vector<64x128xf32>, vector<8x128xf32> -> vector<8x128xf32>
    %309 = vector.broadcast %7 : vector<1x128xf32> to vector<8x128xf32>
    %310 = arith.addf %308, %309 : vector<8x128xf32>
    %311 = arith.negf %310 : vector<8x128xf32>
    %312 = math.exp %311 : vector<8x128xf32>
    %cst_95 = arith.constant 1.000000e+00 : f32
    %313 = vector.broadcast %cst_95 : f32 to vector<8x128xf32>
    %314 = arith.addf %313, %312 : vector<8x128xf32>
    %315 = arith.divf %313, %314 : vector<8x128xf32>
    %316 = math.tanh %310 : vector<8x128xf32>
    %317 = vector.extract_strided_slice %315 {offsets = [0, 0], sizes = [8, 32], strides = [1, 1]} : vector<8x128xf32> to vector<8x32xf32>
    %318 = vector.extract_strided_slice %315 {offsets = [0, 32], sizes = [8, 32], strides = [1, 1]} : vector<8x128xf32> to vector<8x32xf32>
    %319 = vector.extract_strided_slice %316 {offsets = [0, 64], sizes = [8, 32], strides = [1, 1]} : vector<8x128xf32> to vector<8x32xf32>
    %320 = vector.extract_strided_slice %315 {offsets = [0, 96], sizes = [8, 32], strides = [1, 1]} : vector<8x128xf32> to vector<8x32xf32>
    %321 = arith.mulf %318, %282 : vector<8x32xf32>
    %322 = arith.mulf %317, %319 : vector<8x32xf32>
    %323 = arith.addf %321, %322 : vector<8x32xf32>
    %324 = math.tanh %323 : vector<8x32xf32>
    %325 = arith.mulf %320, %324 : vector<8x32xf32>
    %cst_96 = arith.constant dense<0.000000e+00> : vector<8x32xf32>
    %326 = tpu.matmul %325, %3, %cst_96 {dimension_numbers = #tpu.dot_dimension_numbers<[1], [0], [0], [1], [0, 0, 1, 1], [], []>} : vector<8x32xf32>, vector<32x32xf32>, vector<8x32xf32> -> vector<8x32xf32>
    %327 = vector.broadcast %8 : vector<1x32xf32> to vector<8x32xf32>
    %328 = arith.addf %326, %327 : vector<8x32xf32>
    %329 = vector.shape_cast %328 : vector<8x32xf32> to vector<1x8x32xf32>
    %330 = vector.broadcast %329 : vector<1x8x32xf32> to vector<8x8x32xf32>
    %331 = arith.addf %222, %330 : vector<8x8x32xf32>
    %332 = math.tanh %331 : vector<8x8x32xf32>
    %333 = vector.shape_cast %332 : vector<8x8x32xf32> to vector<64x32xf32>
    %cst_97 = arith.constant dense<0.000000e+00> : vector<64x1xf32>
    %334 = tpu.matmul %333, %10, %cst_97 {dimension_numbers = #tpu.dot_dimension_numbers<[1], [1], [0], [0], [0, 0, 1, 0], [], []>} : vector<64x32xf32>, vector<1x32xf32>, vector<64x1xf32> -> vector<64x1xf32>
    %335 = vector.shape_cast %334 : vector<64x1xf32> to vector<8x8x1xf32>
    %cst_98 = arith.constant dense<0xFF800000> : vector<8x1xf32>
    %336 = vector.multi_reduction <maximumf>, %335, %cst_98 [0] : vector<8x8x1xf32> to vector<8x1xf32>
    %337 = vector.shape_cast %336 : vector<8x1xf32> to vector<1x8x1xf32>
    %338 = vector.broadcast %337 : vector<1x8x1xf32> to vector<8x8x1xf32>
    %339 = arith.subf %335, %338 : vector<8x8x1xf32>
    %340 = math.exp %339 : vector<8x8x1xf32>
    %cst_99 = arith.constant dense<0.000000e+00> : vector<8x1xf32>
    %341 = vector.multi_reduction <add>, %340, %cst_99 [0] : vector<8x8x1xf32> to vector<8x1xf32>
    %342 = vector.shape_cast %341 : vector<8x1xf32> to vector<1x8x1xf32>
    %343 = vector.broadcast %342 : vector<1x8x1xf32> to vector<8x8x1xf32>
    %344 = arith.divf %340, %343 : vector<8x8x1xf32>
    %345 = vector.broadcast %344 : vector<8x8x1xf32> to vector<8x8x32xf32>
    %346 = arith.mulf %222, %345 : vector<8x8x32xf32>
    %cst_100 = arith.constant dense<0.000000e+00> : vector<8x32xf32>
    %347 = vector.multi_reduction <add>, %346, %cst_100 [0] : vector<8x8x32xf32> to vector<8x32xf32>
    %cst_101 = arith.constant dense<0.000000e+00> : vector<8x32xf32>
    %348 = tpu.matmul %347, %5, %cst_101 {dimension_numbers = #tpu.dot_dimension_numbers<[1], [0], [0], [1], [0, 0, 1, 1], [], []>} : vector<8x32xf32>, vector<32x32xf32>, vector<8x32xf32> -> vector<8x32xf32>
    %349 = vector.broadcast %12 : vector<1x32xf32> to vector<8x32xf32>
    %350 = arith.addf %348, %349 : vector<8x32xf32>
    %cst_102 = arith.constant 0.000000e+00 : f32
    %351 = vector.broadcast %cst_102 : f32 to vector<8x32xf32>
    %352 = arith.maximumf %350, %351 : vector<8x32xf32>
    %cst_103 = arith.constant dense<0.000000e+00> : vector<1x8xf32>
    %353 = tpu.matmul %15, %352, %cst_103 {dimension_numbers = #tpu.dot_dimension_numbers<[1], [1], [0], [0], [0, 0, 1, 0], [], []>} : vector<1x32xf32>, vector<8x32xf32>, vector<1x8xf32> -> vector<1x8xf32>
    %354 = vector.broadcast %13 : vector<1x1xf32> to vector<1x8xf32>
    %355 = arith.addf %353, %354 : vector<1x8xf32>
    %c0_104 = arith.constant 0 : index
    %c0_105 = arith.constant 0 : index
    %356 = vector.load %arg6[%c0_104, %c0_105] : memref<1x8xf32, #tpu.memory_space<vmem>>, vector<1x8xf32>
    tpu.vector_store %arg6[%c0_104, %c0_105], %355 {strides = array<i32>} : memref<1x8xf32, #tpu.memory_space<vmem>>, vector<1x8xf32>,
    return
  }
  func.func @transform_0(%arg0: i32) -> (i32, i32, i32) {
    %c0_i32 = arith.constant 0 : i32
    %c0_i32_0 = arith.constant 0 : i32
    %c0_i32_1 = arith.constant 0 : i32
    return %c0_i32, %arg0, %c0_i32_0 : i32, i32, i32
  }
  func.func @transform_1(%arg0: i32) -> (i32, i32) {
    %c0_i32 = arith.constant 0 : i32
    %c0_i32_0 = arith.constant 0 : i32
    %c0_i32_1 = arith.constant 0 : i32
    return %c0_i32, %c0_i32_0 : i32, i32
  }
  func.func @transform_2(%arg0: i32) -> (i32, i32) {
    %c0_i32 = arith.constant 0 : i32
    %c0_i32_0 = arith.constant 0 : i32
    %c0_i32_1 = arith.constant 0 : i32
    return %c0_i32, %c0_i32_0 : i32, i32
  }
  func.func @transform_3(%arg0: i32) -> (i32, i32) {
    %c0_i32 = arith.constant 0 : i32
    %c0_i32_0 = arith.constant 0 : i32
    %c0_i32_1 = arith.constant 0 : i32
    return %c0_i32, %c0_i32_0 : i32, i32
  }
  func.func @transform_4(%arg0: i32) -> (i32, i32) {
    %c0_i32 = arith.constant 0 : i32
    %c0_i32_0 = arith.constant 0 : i32
    %c0_i32_1 = arith.constant 0 : i32
    return %c0_i32, %c0_i32_0 : i32, i32
  }
  func.func @transform_5(%arg0: i32) -> (i32, i32) {
    %c0_i32 = arith.constant 0 : i32
    %c0_i32_0 = arith.constant 0 : i32
    return %c0_i32, %arg0 : i32, i32
  }
}

</mosaic_0001>

<bundles_post_ra>
// kernel: tpu_custom_call.1
= control target key start
LH: loop header
LB: loop body
LE: loop exit
PB: predicated region body
PF: predicated region fallthrough
CT: control target
= control target key end

     0   :  { %10 = vsyncpa [#allocation5], 0  ;;  %s3822_s0 = inlined_call_operand.vmem [shape: f32[8,8,2], index: 0, kind: input, shape index: {}]   ;;  %s3823_s1 = inlined_call_operand.vmem [shape: f32[128,128], index: 1, kind: input, shape index: {}]   ;;  %s3824_s2 = inlined_call_operand.vmem [shape: f32[64,32], index: 2, kind: input, shape index: {}]   ;;  %s3825_s3 = inlined_call_operand.hbm [shape: f32[32,32], index: 3, kind: input, shape index: {}]   ;;  %s3826_s4 = inlined_call_operand.vmem [shape: f32[11,128], index: 4, kind: input, shape index: {}]   ;;  %s3827_s5 = inlined_call_operand.hbm [shape: f32[1,8], index: 5, kind: output, shape index: {}]  }
   0x1   :  { %11 = vsyncpa [#allocation6], 0  ;;  %s3214_s18 = smov [#allocation4]   ;;  %s3166_s22 = scalar_lea.hbm %s3825_s3, 512 }
   0x2   :  { %s23_s19 = sshll.u32 %s3214_s18, 4  ;;  %p3167_p0 = scmp.ne.s32.totalorder %s3825_s3, %s3166_s22  ;;  %s24_s19 = int_to_ptr.vmem [resolvable:$true] %s23_s19 }
   0x3   :  { %p3170_p1 = scmp.lt.u32.totalorder %s3166_s22, %s3825_s3 }
   0x5   :  { %p3172_p2 = pnand %p3170_p1, %p3167_p0 }
   0x7   :  { %3175 = shalt.err (!%p3172_p2)
}
   0x8   :  { %s3176_s27 = scalar_lea.vmem %s24_s19, 512  ;;  %p3181_p4 = scmp.lt.s32.totalorder %s24_s19, %s24_s19 }
   0x9   :  { %p3177_p3 = scmp.ne.s32.totalorder %s24_s19, %s3176_s27  ;;  %p3182_p5 = scmp.lt.s32.totalorder %s3176_s27, %s3176_s27 }
   0xb   :  { %p3183_p6 = por %p3182_p5, %p3181_p4 }
   0xd   :  { %p3184_p7 = pnand %p3183_p6, %p3177_p3 }
   0xf   :  { %3187 = shalt.err (!%p3184_p7)
}
  0x10   :  { %s3215_s28 = smov 128   ;;  %s3216_s29 = smov 8  }
  0x11   :  { %29 = dma.hbm_to_vmem [thread:$0]  %s3825_s3, 512, %s24_s19, [#allocation5], %s3215_s28, %s3215_s28, %s3216_s29  }
  0x12   :  { %3210 = dma.done.wait [#allocation5], 512  }
  0x13   :  { %3211 = vsyncadd [#allocation5], 4294966784  ;;  %vm106_vm0 = vcmask 1041408   ;;  %vm81_vm1 = vcmask 15360   ;;  %v71_v0 = vld [vmem:[%s3826_s4 + $0x8] sm:$0x3] }
  0x14   :  { %v73_v1 = vld [vmem:[%s3822_s0] sm:$0xff]  ;;  %v74_v2 = vld [vmem:[%s3822_s0 + $0x8] sm:$0xff]  ;;  %2593 = vmatprep.subr.msk.mxu0 %vm106_vm0, %v71_v0  ;;  %v75_v3 = vld [vmem:[%s3822_s0 + $0x10] sm:$0xff]  ;;  %v3217_v6 = vmov 0.0|0.0   ;;  %vm3218_vm2 = vmmov 0   ;;  %v3219_v22 = vmov 0.0  }
  0x15   :  { %2595 = vmatprep.mubr.msk.f32.mxu0 %vm81_vm1, %v73_v1  ;;  %v39_v4 = vld [vmem:[%s3823_s1 + $0x20] sm:$0xff]  ;;  %2594 = vmatpush3.msk.msra.mxu0 %vm106_vm0, %v71_v0  ;;  %v40_v5 = vld [vmem:[%s3823_s1 + $0x28] sm:$0xff]  ;;  %v76_v10 = vld [vmem:[%s3822_s0 + $0x18] sm:$0xff]  ;;  %vm219_vm3 = vcmask 261120   ;;  %s3220_s15 = smov 64   ;;  %s3221_s16 = smov 32  }
  0x16   :  { %2596 = vmatmul.mubr.msk.f32.vlgmr.msra.gmra.mrb[0].mxu0 %vm81_vm1, %v74_v2  ;;  %2849 = vmatprep.subr.bf16.mxu0 %v3217_v6  ;;  %v3287_v7 = vpack.c.bf16 %v40_v5, %v39_v4  ;;  %v35_v8 = vld [vmem:[%s3823_s1] sm:$0xff]  ;;  %v36_v9 = vld [vmem:[%s3823_s1 + $0x8] sm:$0xff]  ;;  %v37_v12 = vld [vmem:[%s3823_s1 + $0x10] sm:$0xff]  ;;  %vm1349_vm4 = vcmask 523264   ;;  %s3223_s11 = smov [#allocation7]   ;;  %vm2395_vm5 = vcmask 57344  }
  0x17   :  { %2598 = vmatprep.mubr.msk.f32.mxu0 %vm81_vm1, %v75_v3  ;;  %v2841_v11 = vpack.c.bf16 %v36_v9, %v35_v8  ;;  %v38_v13 = vld [vmem:[%s3823_s1 + $0x18] sm:$0xff]  ;;  %v77_v14 = vld [vmem:[%s3822_s0 + $0x20] sm:$0xff]  ;;  %v41_v16 = vld [vmem:[%s3823_s1 + $0x30] sm:$0xff]  ;;  %s2403_s12 = sshll.u32 %s3223_s11, 4  ;;  %s2404_s12 = int_to_ptr.vmem [resolvable:$true] %s2403_s12 }
  0x18   :  { %2851 = vmatpush3.bf16.msra.mxu0 %v3287_v7  ;;  %v2845_v15 = vpack.c.bf16 %v38_v13, %v37_v12  ;;  %v42_v17 = vld [vmem:[%s3823_s1 + $0x38] sm:$0xff]  ;;  %v78_v19 = vld [vmem:[%s3822_s0 + $0x28] sm:$0xff]  ;;  %v79_v20 = vld [vmem:[%s3822_s0 + $0x30] sm:$0xff]  ;;  %s3188_s3 = scalar_lea.vmem %s2404_s12, 16  ;;  %s3192_s13 = scalar_lea.vmem %s2404_s12, 32 }
  0x19   :  { %2842 = vmatprep.subr.bf16.mxu1 %v2841_v11  ;;  %2852 = vmatprep.subr.bf16.mxu0 %v3217_v6  ;;  %v3316_v18 = vpack.c.bf16 %v42_v17, %v41_v16  ;;  %v80_v21 = vld [vmem:[%s3822_s0 + $0x38] sm:$0xff]  ;;  %v2421_v33 = vld [vmem:[%s3826_s4] ss:$0 sm:$0xff]  ;;  %p3189_p8 = scmp.ne.s32.totalorder %s2404_s12, %s3188_s3  ;;  %p3193_p9 = scmp.lt.s32.totalorder %s2404_s12, %s2404_s12 }
  0x1a   :  { %2599 = vmatmul.mubr.msk.f32.gmra.mrb[2].mxu0 %vm81_vm1, %v76_v10  ;;  %2844 = vmatpush3.bf16.msra.mxu1 %v2841_v11  ;;  %p3194_p10 = scmp.lt.s32.totalorder %s3192_s13, %s3188_s3 }
  0x1b   :  { %2601 = vmatprep.mubr.msk.f32.mxu0 %vm81_vm1, %v77_v14  ;;  %2846 = vmatprep.subr.bf16.mxu1 %v2845_v15 }
  0x1c   :  { %2854 = vmatpush3.bf16.msra.mxu0 %v3316_v18  ;;  %p3195_p11 = por %p3194_p10, %p3193_p9 }
  0x1d   :  { %2861 = vmatprep.subr.bf16.mxu0 %v3217_v6 }
  0x1e   :  { %2602 = vmatmul.mubr.msk.f32.gmra.mrb[4].mxu0 %vm81_vm1, %v78_v19  ;;  %2848 = vmatpush3.bf16.msra.mxu1 %v2845_v15  ;;  %p3196_p12 = pnand %p3195_p11, %p3189_p8 }
  0x1f   :  { %2604 = vmatprep.mubr.msk.f32.mxu0 %vm81_vm1, %v79_v20  ;;  %2855 = vmatprep.subr.bf16.mxu1 %v3217_v6 }
  0x22   :  { %2605 = vmatmul.mubr.msk.f32.gmra.mrb[6].mxu0 %vm81_vm1, %v80_v21 }
  0x23   :  { %2635 = vmatprep.mubr.msk.f32.mxu0 %vm3218_vm2, %v3219_v22 }
  0x26   :  { %2636 = vmatmul.mubr.f32.vlgmr.msra.gmra.mrb[8].mxu0 %v3219_v22 }
  0x27   :  { %2863 = vmatpush3.bf16.msra.mxu0 %v3287_v7  ;;  %2657 = vmatprep.mubr.msk.f32.mxu0 %vm3218_vm2, %v3219_v22 }
  0x28   :  { %2864 = vmatprep.subr.bf16.mxu0 %v3217_v6 }
  0x2b   :  { %2866 = vmatpush3.bf16.msra.mxu0 %v3316_v18 }
  0x2c   :  { %2873 = vmatprep.subr.bf16.mxu0 %v3217_v6 }
  0xe9   :  { %v2597_v23 = vpop.f32.mrb[0].mxu0 }
  0xea   :  { %v176_v24 = vpop.f32.mrb[1].mxu0 }
  0xeb   :  { %2615 = vmatprep.mubr.msk.f32.mxu1 %vm219_vm3, %v176_v24 }
  0xec   :  { %2616 = vmatmul.mubr.msk.f32.vlgmr.msra.gmra.mrb[0].mxu1 %vm219_vm3, %v2597_v23 }
  0xed   :  { %v2600_v25 = vpop.f32.mrb[2].mxu0  ;;  %2857 = vmatpush3.bf16.msra.mxu1 %v3287_v7 }
  0xee   :  { %v186_v26 = vpop.f32.mrb[3].mxu0  ;;  %2858 = vmatprep.subr.bf16.mxu1 %v3217_v6 }
  0xef   :  { %2618 = vmatprep.mubr.msk.f32.mxu1 %vm219_vm3, %v186_v26 }
  0xf0   :  { %2619 = vmatmul.mubr.msk.f32.gmra.mrb[2].mxu1 %vm219_vm3, %v2600_v25 }
  0xf1   :  { %v2603_v27 = vpop.f32.mrb[4].mxu0  ;;  %2860 = vmatpush3.bf16.msra.mxu1 %v3316_v18 }
  0xf2   :  { %v196_v28 = vpop.f32.mrb[5].mxu0  ;;  %2867 = vmatprep.subr.bf16.mxu1 %v3217_v6 }
  0xf3   :  { %2621 = vmatprep.mubr.msk.f32.mxu1 %vm219_vm3, %v196_v28 }
  0xf4   :  { %2622 = vmatmul.mubr.msk.f32.gmra.mrb[4].mxu1 %vm219_vm3, %v2603_v27 }
  0xf5   :  { %v2606_v29 = vpop.f32.mrb[6].mxu0 }
  0xf6   :  { %v206_v30 = vpop.f32.mrb[7].mxu0 }
  0xf7   :  { %2624 = vmatprep.mubr.msk.f32.mxu1 %vm219_vm3, %v206_v30 }
  0xf8   :  { %2625 = vmatmul.mubr.msk.f32.gmra.mrb[6].mxu1 %vm219_vm3, %v2606_v29 }
  0xf9   :  { %2646 = vmatprep.mubr.msk.f32.mxu1 %vm3218_vm2, %v3219_v22  ;;  %v427_v31 = vpop.f32.mrb[8].mxu0 }
  0xfa   :  { %v2637_v32 = vpop.f32.mrb[9].mxu0 }
 0x1bf   :  { %v2617_v34 = vpop.f32.mrb[0].mxu1 }
 0x1c0   :  { %v316_v35 = vadd.f32 %v2617_v34, %v2421_v33  ;;  %v310_v36 = vpop.f32.mrb[1].mxu1 }
 0x1c1   :  { %v311_v37 = vadd.f32 %v2421_v33, %v310_v36 }
 0x1c3   :  { %v431_v38 = vadd.f32 %v427_v31, %v311_v37  ;;  %v2620_v39 = vpop.f32.mrb[2].mxu1 }
 0x1c4   :  { %v3361_v40 = vadd.f32 %v2620_v39, %v2421_v33  ;;  %v320_v41 = vpop.f32.mrb[3].mxu1 }
 0x1c5   :  { %2976 = vtanh.f32 %v431_v38  ;;  %v3363_v42 = vadd.f32 %v2421_v33, %v320_v41  ;;  %v2430_v52 = vmul.f32 -1.442695, %v431_v38 }
 0x1c7   :  { %v2623_v43 = vpop.f32.mrb[4].mxu1  ;;  %2978 = vpow2.f32 %v2430_v52 }
 0x1c8   :  { %v3365_v44 = vadd.f32 %v2623_v43, %v2421_v33  ;;  %v330_v45 = vpop.f32.mrb[5].mxu1 }
 0x1c9   :  { %v3367_v46 = vadd.f32 %v2421_v33, %v330_v45 }
 0x1cb   :  { %v2626_v47 = vpop.f32.mrb[6].mxu1 }
 0x1cc   :  { %v3369_v48 = vadd.f32 %v2626_v47, %v2421_v33  ;;  %v340_v49 = vpop.f32.mrb[7].mxu1 }
 0x1cd   :  { %v3371_v50 = vadd.f32 %v2421_v33, %v340_v49 }
 0x1cf   :  { %v2977_v51 = vpop.eup %2976 }
 0x1d0   :  { %441 = vrot.lane.b32.xlu0 %v2977_v51, %s3220_s15 }
 0x1d1   :  { %v2979_v53 = vpop.eup %2978 }
 0x1d2   :  { %v435_v54 = vadd.f32 1.0, %v2979_v53 }
 0x1d4   :  { %2980 = vrcp.f32 %v435_v54 }
 0x1de   :  { %v2981_v55 = vpop.eup %2980 }
 0x1df   :  { %v439_v58 = vmul.f32 0.0, %v2981_v55 }
 0x242   :  { %v442_v56 = vpop.permute.xlu0 %441 }
 0x243   :  { %v444_v57 = vmul.f32 %v2981_v55, %v442_v56 }
 0x245   :  { %446 = vrot.lane.b32.xlu0 %v444_v57, %s3221_s16 }
 0x2b7   :  { %v447_v59 = vpop.permute.xlu0 %446 }
 0x2b8   :  { %v449_v60 = vadd.f32 %v447_v59, %v439_v58 }
 0x2ba   :  { %2982 = vtanh.f32 %v449_v60 }
 0x2c4   :  { %v2983_v61 = vpop.eup %2982 }
 0x2c5   :  { %452 = vrot.lane.b32.xlu1 %v2983_v61, %s3220_s15 }
 0x337   :  { %v453_v62 = vpop.permute.xlu1 %452 }
 0x338   :  { %v455_v63 = vmul.f32 %v2981_v55, %v453_v62 }
 0x33a   :  { %457 = vrot.lane.b32.xlu1 %v455_v63, %s3221_s16 }
 0x3ac   :  { %v458_v0 = vpop.permute.xlu1 %457 }
 0x3ad   :  { %460 = vst.msk [vmem:[#allocation3] sm:$0xff] %vm219_vm3, %v458_v0  ;;  %2647 = vmatmul.mubr.msk.f32.vlgmr.msra.gmra.mrb[8].mxu1 %vm219_vm3, %v458_v0 }
 0x3ae   :  { %2869 = vmatpush3.bf16.msra.mxu1 %v3287_v7  ;;  %2668 = vmatprep.mubr.msk.f32.mxu1 %vm3218_vm2, %v3219_v22 }
 0x3af   :  { %2870 = vmatprep.subr.bf16.mxu1 %v3217_v6 }
 0x3b2   :  { %2872 = vmatpush3.bf16.msra.mxu1 %v3316_v18 }
 0x3b3   :  { %2879 = vmatprep.subr.bf16.mxu1 %v3217_v6 }
 0x480   :  { %v531_v1 = vpop.f32.mrb[8].mxu1 }
 0x481   :  { %v535_v2 = vadd.f32 %v531_v1, %v316_v35  ;;  %v2648_v3 = vpop.f32.mrb[9].mxu1 }
 0x483   :  { %2984 = vtanh.f32 %v535_v2  ;;  %v2432_v5 = vmul.f32 -1.442695, %v535_v2 }
 0x485   :  { %2986 = vpow2.f32 %v2432_v5 }
 0x48d   :  { %v2985_v4 = vpop.eup %2984 }
 0x48e   :  { %545 = vrot.lane.b32.xlu0 %v2985_v4, %s3220_s15 }
 0x48f   :  { %v2987_v8 = vpop.eup %2986 }
 0x490   :  { %v539_v9 = vadd.f32 1.0, %v2987_v8 }
 0x492   :  { %2988 = vrcp.f32 %v539_v9 }
 0x49c   :  { %v2989_v10 = vpop.eup %2988 }
 0x49d   :  { %v543_v13 = vmul.f32 %v2989_v10, %v449_v60 }
 0x500   :  { %v546_v11 = vpop.permute.xlu0 %545 }
 0x501   :  { %v548_v12 = vmul.f32 %v2989_v10, %v546_v11 }
 0x503   :  { %550 = vrot.lane.b32.xlu1 %v548_v12, %s3221_s16 }
 0x575   :  { %v551_v14 = vpop.permute.xlu1 %550 }
 0x576   :  { %v553_v15 = vadd.f32 %v551_v14, %v543_v13 }
 0x578   :  { %2990 = vtanh.f32 %v553_v15 }
 0x582   :  { %v2991_v16 = vpop.eup %2990 }
 0x583   :  { %556 = vrot.lane.b32.xlu0 %v2991_v16, %s3220_s15 }
 0x5f5   :  { %v557_v17 = vpop.permute.xlu0 %556 }
 0x5f6   :  { %v559_v19 = vmul.f32 %v2989_v10, %v557_v17 }
 0x5f8   :  { %561 = vrot.lane.b32.xlu1 %v559_v19, %s3221_s16 }
 0x66a   :  { %v562_v20 = vpop.permute.xlu1 %561 }
 0x66b   :  { %565 = vst.msk [vmem:[#allocation3 + $0x8] sm:$0xff] %vm219_vm3, %v562_v20  ;;  %2658 = vmatmul.mubr.msk.f32.vlgmr.msra.gmra.mrb[10].mxu0 %vm219_vm3, %v562_v20 }
 0x66c   :  { %2875 = vmatpush3.bf16.msra.mxu0 %v3287_v7  ;;  %2679 = vmatprep.mubr.msk.f32.mxu0 %vm3218_vm2, %v3219_v22 }
 0x66d   :  { %2876 = vmatprep.subr.bf16.mxu0 %v3217_v6 }
 0x670   :  { %2878 = vmatpush3.bf16.msra.mxu0 %v3316_v18 }
 0x671   :  { %2885 = vmatprep.subr.bf16.mxu0 %v3217_v6 }
 0x73e   :  { %v636_v21 = vpop.f32.mrb[10].mxu0 }
 0x73f   :  { %v640_v23 = vadd.f32 %v636_v21, %v3363_v42  ;;  %v2659_v24 = vpop.f32.mrb[11].mxu0 }
 0x741   :  { %2992 = vtanh.f32 %v640_v23  ;;  %v2434_v26 = vmul.f32 -1.442695, %v640_v23 }
 0x743   :  { %2994 = vpow2.f32 %v2434_v26 }
 0x74b   :  { %v2993_v25 = vpop.eup %2992 }
 0x74c   :  { %650 = vrot.lane.b32.xlu0 %v2993_v25, %s3220_s15 }
 0x74d   :  { %v2995_v27 = vpop.eup %2994 }
 0x74e   :  { %v644_v28 = vadd.f32 1.0, %v2995_v27  ;;  %v56_v27 = vld [vmem:[%s3824_s2 + $0x28] sm:$0xff] }
 0x750   :  { %2996 = vrcp.f32 %v644_v28 }
 0x75a   :  { %v2997_v29 = vpop.eup %2996 }
 0x75b   :  { %v648_v32 = vmul.f32 %v2997_v29, %v553_v15 }
 0x7be   :  { %v651_v30 = vpop.permute.xlu0 %650 }
 0x7bf   :  { %v653_v31 = vmul.f32 %v2997_v29, %v651_v30 }
 0x7c1   :  { %655 = vrot.lane.b32.xlu1 %v653_v31, %s3221_s16 }
 0x833   :  { %v656_v33 = vpop.permute.xlu1 %655 }
 0x834   :  { %v658_v34 = vadd.f32 %v656_v33, %v648_v32  ;;  %v57_v32 = vld [vmem:[%s3824_s2 + $0x30] sm:$0xff]  ;;  %v58_v33 = vld [vmem:[%s3824_s2 + $0x38] sm:$0xff] }
 0x836   :  { %2998 = vtanh.f32 %v658_v34 }
 0x840   :  { %v2999_v35 = vpop.eup %2998 }
 0x841   :  { %661 = vrot.lane.b32.xlu0 %v2999_v35, %s3220_s15 }
 0x8b3   :  { %v662_v36 = vpop.permute.xlu0 %661 }
 0x8b4   :  { %v664_v37 = vmul.f32 %v2997_v29, %v662_v36  ;;  %v1196_v36 = vld [vmem:[#allocation3] sm:$0xff] }
 0x8b6   :  { %666 = vrot.lane.b32.xlu1 %v664_v37, %s3221_s16  ;;  %v1197_v37 = vld [vmem:[#allocation3 + $0x8] sm:$0xff] }
 0x928   :  { %v667_v38 = vpop.permute.xlu1 %666 }
 0x929   :  { %670 = vst.msk [vmem:[#allocation3 + $0x10] sm:$0xff] %vm219_vm3, %v667_v38  ;;  %2669 = vmatmul.mubr.msk.f32.vlgmr.msra.gmra.mrb[10].mxu1 %vm219_vm3, %v667_v38 }
 0x92a   :  { %2881 = vmatpush3.bf16.msra.mxu1 %v3287_v7  ;;  %2690 = vmatprep.mubr.msk.f32.mxu1 %vm3218_vm2, %v3219_v22 }
 0x92b   :  { %2882 = vmatprep.subr.bf16.mxu1 %v3217_v6 }
 0x92e   :  { %2884 = vmatpush3.bf16.msra.mxu1 %v3316_v18 }
 0x92f   :  { %2891 = vmatprep.subr.bf16.mxu1 %v3217_v6 }
 0x930   :  { %v1198_v38 = vld [vmem:[#allocation3 + $0x10] sm:$0xff] }
 0x9fc   :  { %v741_v39 = vpop.f32.mrb[10].mxu1 }
 0x9fd   :  { %v745_v41 = vadd.f32 %v741_v39, %v3361_v40  ;;  %v2670_v42 = vpop.f32.mrb[11].mxu1 }
 0x9ff   :  { %3000 = vtanh.f32 %v745_v41  ;;  %v2436_v45 = vmul.f32 -1.442695, %v745_v41 }
 0xa01   :  { %3002 = vpow2.f32 %v2436_v45 }
 0xa09   :  { %v3001_v43 = vpop.eup %3000 }
 0xa0a   :  { %755 = vrot.lane.b32.xlu0 %v3001_v43, %s3220_s15 }
 0xa0b   :  { %v3003_v47 = vpop.eup %3002 }
 0xa0c   :  { %v749_v49 = vadd.f32 1.0, %v3003_v47 }
 0xa0e   :  { %3004 = vrcp.f32 %v749_v49 }
 0xa18   :  { %v3005_v51 = vpop.eup %3004 }
 0xa19   :  { %v753_v54 = vmul.f32 %v3005_v51, %v658_v34  ;;  %v2901_v34 = vpack.c.bf16 %v58_v33, %v57_v32  ;;  %v2454_v32 = vld [vmem:[%s3826_s4 + $0x5] ss:$0 sm:$0xff] }
 0xa7c   :  { %v756_v52 = vpop.permute.xlu0 %755 }
 0xa7d   :  { %v758_v53 = vmul.f32 %v3005_v51, %v756_v52 }
 0xa7f   :  { %760 = vrot.lane.b32.xlu1 %v758_v53, %s3221_s16 }
 0xaf1   :  { %v761_v55 = vpop.permute.xlu1 %760 }
 0xaf2   :  { %v763_v56 = vadd.f32 %v761_v55, %v753_v54 }
 0xaf4   :  { %3006 = vtanh.f32 %v763_v56 }
 0xafe   :  { %v3007_v40 = vpop.eup %3006 }
 0xaff   :  { %766 = vrot.lane.b32.xlu0 %v3007_v40, %s3220_s15 }
 0xb71   :  { %v767_v57 = vpop.permute.xlu0 %766 }
 0xb72   :  { %v769_v58 = vmul.f32 %v3005_v51, %v767_v57 }
 0xb74   :  { %771 = vrot.lane.b32.xlu1 %v769_v58, %s3221_s16 }
 0xbe6   :  { %v772_v59 = vpop.permute.xlu1 %771 }
 0xbe7   :  { %775 = vst.msk [vmem:[#allocation3 + $0x18] sm:$0xff] %vm219_vm3, %v772_v59  ;;  %2680 = vmatmul.mubr.msk.f32.vlgmr.msra.gmra.mrb[12].mxu0 %vm219_vm3, %v772_v59 }
 0xbe8   :  { %2887 = vmatpush3.bf16.msra.mxu0 %v3287_v7  ;;  %2701 = vmatprep.mubr.msk.f32.mxu0 %vm3218_vm2, %v3219_v22 }
 0xbe9   :  { %2888 = vmatprep.subr.bf16.mxu0 %v3217_v6 }
 0xbec   :  { %2890 = vmatpush3.bf16.msra.mxu0 %v3316_v18 }
 0xbee   :  { %v1199_v39 = vld [vmem:[#allocation3 + $0x18] sm:$0xff] }
 0xcba   :  { %v846_v60 = vpop.f32.mrb[12].mxu0 }
 0xcbb   :  { %v850_v61 = vadd.f32 %v846_v60, %v3367_v46  ;;  %v2681_v62 = vpop.f32.mrb[13].mxu0 }
 0xcbd   :  { %3008 = vtanh.f32 %v850_v61  ;;  %v2438_v0 = vmul.f32 -1.442695, %v850_v61 }
 0xcbf   :  { %3010 = vpow2.f32 %v2438_v0 }
 0xcc7   :  { %v3009_v63 = vpop.eup %3008 }
 0xcc8   :  { %860 = vrot.lane.b32.xlu0 %v3009_v63, %s3220_s15 }
 0xcc9   :  { %v3011_v1 = vpop.eup %3010 }
 0xcca   :  { %v854_v2 = vadd.f32 1.0, %v3011_v1 }
 0xccc   :  { %3012 = vrcp.f32 %v854_v2 }
 0xcd6   :  { %v3013_v3 = vpop.eup %3012 }
 0xcd7   :  { %v858_v8 = vmul.f32 %v3013_v3, %v763_v56 }
 0xd3a   :  { %v861_v4 = vpop.permute.xlu0 %860 }
 0xd3b   :  { %v863_v5 = vmul.f32 %v3013_v3, %v861_v4 }
 0xd3d   :  { %865 = vrot.lane.b32.xlu1 %v863_v5, %s3221_s16 }
 0xdaf   :  { %v866_v9 = vpop.permute.xlu1 %865 }
 0xdb0   :  { %v868_v10 = vadd.f32 %v866_v9, %v858_v8 }
 0xdb2   :  { %3014 = vtanh.f32 %v868_v10 }
 0xdbc   :  { %v3015_v46 = vpop.eup %3014 }
 0xdbd   :  { %871 = vrot.lane.b32.xlu0 %v3015_v46, %s3220_s15 }
 0xe2f   :  { %v872_v11 = vpop.permute.xlu0 %871 }
 0xe30   :  { %v874_v12 = vmul.f32 %v3013_v3, %v872_v11 }
 0xe32   :  { %876 = vrot.lane.b32.xlu1 %v874_v12, %s3221_s16 }
 0xea4   :  { %v877_v13 = vpop.permute.xlu1 %876 }
 0xea5   :  { %880 = vst.msk [vmem:[#allocation3 + $0x20] sm:$0xff] %vm219_vm3, %v877_v13  ;;  %2691 = vmatmul.mubr.msk.f32.vlgmr.msra.gmra.mrb[12].mxu1 %vm219_vm3, %v877_v13 }
 0xea6   :  { %2893 = vmatpush3.bf16.msra.mxu1 %v3287_v7  ;;  %2712 = vmatprep.mubr.msk.f32.mxu1 %vm3218_vm2, %v3219_v22 }
 0xea7   :  { %2894 = vmatprep.subr.bf16.mxu1 %v3217_v6 }
 0xeaa   :  { %2896 = vmatpush3.bf16.msra.mxu1 %v3316_v18 }
 0xeab   :  { %2905 = vmatprep.subr.bf16.mxu1 %v3217_v6 }
 0xeac   :  { %v1200_v41 = vld [vmem:[#allocation3 + $0x20] sm:$0xff] }
 0xf78   :  { %v951_v14 = vpop.f32.mrb[12].mxu1 }
 0xf79   :  { %v955_v15 = vadd.f32 %v951_v14, %v3365_v44  ;;  %v2692_v16 = vpop.f32.mrb[13].mxu1  ;;  %v55_v44 = vld [vmem:[%s3824_s2 + $0x20] sm:$0xff] }
 0xf7a   :  { %v2897_v28 = vpack.c.bf16 %v56_v27, %v55_v44  ;;  %v49_v44 = vld [vmem:[%s3823_s1 + $0x70] sm:$0xff]  ;;  %v50_v27 = vld [vmem:[%s3823_s1 + $0x78] sm:$0xff] }
 0xf7b   :  { %3016 = vtanh.f32 %v955_v15  ;;  %v2440_v19 = vmul.f32 -1.442695, %v955_v15 }
 0xf7c   :  { %2898 = vmatprep.subr.bf16.mxu0 %v2897_v28 }
 0xf7d   :  { %3018 = vpow2.f32 %v2440_v19 }
 0xf85   :  { %v3017_v17 = vpop.eup %3016 }
 0xf86   :  { %965 = vrot.lane.b32.xlu0 %v3017_v17, %s3220_s15 }
 0xf87   :  { %v3019_v7 = vpop.eup %3018 }
 0xf88   :  { %v959_v20 = vadd.f32 1.0, %v3019_v7  ;;  %v44_v7 = vld [vmem:[%s3823_s1 + $0x48] sm:$0xff] }
 0xf8a   :  { %3020 = vrcp.f32 %v959_v20  ;;  %v45_v20 = vld [vmem:[%s3823_s1 + $0x50] sm:$0xff] }
 0xf94   :  { %v3021_v21 = vpop.eup %3020 }
 0xf95   :  { %v963_v18 = vmul.f32 %v3021_v21, %v868_v10 }
 0xff8   :  { %v966_v23 = vpop.permute.xlu0 %965 }
 0xff9   :  { %v968_v24 = vmul.f32 %v3021_v21, %v966_v23  ;;  %v46_v23 = vld [vmem:[%s3823_s1 + $0x58] sm:$0xff] }
 0xffb   :  { %970 = vrot.lane.b32.xlu1 %v968_v24, %s3221_s16  ;;  %v3501_v24 = vpack.c.bf16 %v46_v23, %v45_v20 }
0x106d   :  { %v971_v25 = vpop.permute.xlu1 %970 }
0x106e   :  { %v973_v26 = vadd.f32 %v971_v25, %v963_v18  ;;  %v47_v18 = vld [vmem:[%s3823_s1 + $0x60] sm:$0xff]  ;;  %v48_v25 = vld [vmem:[%s3823_s1 + $0x68] sm:$0xff] }
0x1070   :  { %3022 = vtanh.f32 %v973_v26 }
0x107a   :  { %v3023_v29 = vpop.eup %3022 }
0x107b   :  { %976 = vrot.lane.b32.xlu0 %v3023_v29, %s3220_s15  ;;  %v3522_v29 = vpack.c.bf16 %v50_v27, %v49_v44 }
0x10ed   :  { %v977_v30 = vpop.permute.xlu0 %976 }
0x10ee   :  { %v979_v31 = vmul.f32 %v3021_v21, %v977_v30 }
0x10f0   :  { %981 = vrot.lane.b32.xlu1 %v979_v31, %s3221_s16 }
0x1162   :  { %v982_v35 = vpop.permute.xlu1 %981 }
0x1163   :  { %985 = vst.msk [vmem:[#allocation3 + $0x28] sm:$0xff] %vm219_vm3, %v982_v35  ;;  %2702 = vmatmul.mubr.msk.f32.vlgmr.msra.gmra.mrb[14].mxu0 %vm219_vm3, %v982_v35  ;;  %v3546_v35 = vld [vmem:[%s3826_s4 + $0x1] ss:$0 sm:$0xff] }
0x1164   :  { %2900 = vmatpush3.bf16.msra.mxu0 %v2897_v28  ;;  %2723 = vmatprep.mubr.msk.f32.mxu0 %vm219_vm3, %v1196_v36 }
0x1165   :  { %2902 = vmatprep.subr.bf16.mxu0 %v2901_v34 }
0x1168   :  { %2904 = vmatpush3.bf16.msra.mxu0 %v2901_v34 }
0x1169   :  { %2917 = vmatprep.subr.bf16.mxu0 %v3217_v6 }
0x116a   :  { %v1201_v42 = vld [vmem:[#allocation3 + $0x28] sm:$0xff] }
0x116b   :  { %2724 = vmatmul.mubr.msk.f32.vlgmr.msra.gmra.mrb[16].mxu0 %vm219_vm3, %v1197_v37 }
0x116c   :  { %2726 = vmatprep.mubr.msk.f32.mxu0 %vm219_vm3, %v1198_v38 }
0x116f   :  { %2727 = vmatmul.mubr.msk.f32.gmra.mrb[18].mxu0 %vm219_vm3, %v1199_v39 }
0x1170   :  { %2729 = vmatprep.mubr.msk.f32.mxu0 %vm219_vm3, %v1200_v41 }
0x1173   :  { %2730 = vmatmul.mubr.msk.f32.gmra.mrb[20].mxu0 %vm219_vm3, %v1201_v42 }
0x1236   :  { %v1056_v43 = vpop.f32.mrb[14].mxu0 }
0x1237   :  { %v1060_v45 = vadd.f32 %v1056_v43, %v3371_v50  ;;  %v2703_v47 = vpop.f32.mrb[15].mxu0 }
0x1239   :  { %3024 = vtanh.f32 %v1060_v45  ;;  %v2442_v40 = vmul.f32 -1.442695, %v1060_v45 }
0x123b   :  { %3026 = vpow2.f32 %v2442_v40 }
0x123e   :  { %v3462_v49 = vpop.f32.mrb[16].mxu0 }
0x123f   :  { %v3464_v51 = vpop.f32.mrb[17].mxu0 }
0x1242   :  { %v3466_v52 = vpop.f32.mrb[18].mxu0 }
0x1243   :  { %v3025_v53 = vpop.eup %3024  ;;  %v3468_v54 = vpop.f32.mrb[19].mxu0 }
0x1244   :  { %1070 = vrot.lane.b32.xlu0 %v3025_v53, %s3220_s15 }
0x1245   :  { %v3027_v50 = vpop.eup %3026 }
0x1246   :  { %v3471_v55 = vpop.f32.mrb[20].mxu0  ;;  %v1064_v57 = vadd.f32 1.0, %v3027_v50 }
0x1247   :  { %v3473_v56 = vpop.f32.mrb[21].mxu0 }
0x1248   :  { %3028 = vrcp.f32 %v1064_v57 }
0x1252   :  { %v3029_v58 = vpop.eup %3028 }
0x1253   :  { %v1068_v61 = vmul.f32 %v3029_v58, %v973_v26  ;;  %v3511_v26 = vpack.c.bf16 %v48_v25, %v47_v18  ;;  %v3633_v25 = vld [vmem:[%s3826_s4 + $0x4] ss:$0 sm:$0xff] }
0x12b6   :  { %v1071_v59 = vpop.permute.xlu0 %1070 }
0x12b7   :  { %v1073_v60 = vmul.f32 %v3029_v58, %v1071_v59 }
0x12b9   :  { %1075 = vrot.lane.b32.xlu1 %v1073_v60, %s3221_s16 }
0x132b   :  { %v1076_v62 = vpop.permute.xlu1 %1075 }
0x132c   :  { %v1078_v63 = vadd.f32 %v1076_v62, %v1068_v61  ;;  %v51_v61 = vld [vmem:[%s3824_s2] sm:$0xff]  ;;  %v52_v62 = vld [vmem:[%s3824_s2 + $0x8] sm:$0xff] }
0x132e   :  { %3030 = vtanh.f32 %v1078_v63 }
0x1338   :  { %v3031_v0 = vpop.eup %3030 }
0x1339   :  { %1081 = vrot.lane.b32.xlu0 %v3031_v0, %s3220_s15  ;;  %v3569_v0 = vpack.c.bf16 %v52_v62, %v51_v61 }
0x133b   :  { %2919 = vmatpush3.bf16.msra.mxu0 %v3569_v0 }
0x133c   :  { %2920 = vmatprep.subr.bf16.mxu0 %v3217_v6 }
0x13ab   :  { %v1082_v1 = vpop.permute.xlu0 %1081 }
0x13ac   :  { %v1084_v2 = vmul.f32 %v3029_v58, %v1082_v1  ;;  %v54_v1 = vld [vmem:[%s3824_s2 + $0x18] sm:$0xff] }
0x13ae   :  { %1086 = vrot.lane.b32.xlu1 %v1084_v2, %s3221_s16 }
0x1420   :  { %v1087_v3 = vpop.permute.xlu1 %1086 }
0x1421   :  { %1090 = vst.msk [vmem:[#allocation3 + $0x30] sm:$0xff] %vm219_vm3, %v1087_v3  ;;  %2713 = vmatmul.mubr.msk.f32.vlgmr.msra.gmra.mrb[14].mxu1 %vm219_vm3, %v1087_v3 }
0x1422   :  { %2751 = vmatprep.mubr.msk.f32.mxu1 %vm3218_vm2, %v3219_v22 }
0x1428   :  { %v1202_v4 = vld [vmem:[#allocation3 + $0x30] sm:$0xff] }
0x1429   :  { %2732 = vmatprep.mubr.msk.f32.mxu0 %vm219_vm3, %v1202_v4 }
0x14f4   :  { %v1161_v5 = vpop.f32.mrb[14].mxu1 }
0x14f5   :  { %v1165_v8 = vadd.f32 %v1161_v5, %v3369_v48  ;;  %v2714_v9 = vpop.f32.mrb[15].mxu1  ;;  %v43_v48 = vld [vmem:[%s3823_s1 + $0x40] sm:$0xff] }
0x14f6   :  { %v3495_v21 = vpack.c.bf16 %v44_v7, %v43_v48 }
0x14f7   :  { %3032 = vtanh.f32 %v1165_v8  ;;  %v2444_v46 = vmul.f32 -1.442695, %v1165_v8 }
0x14f8   :  { %2907 = vmatpush3.bf16.msra.mxu1 %v3495_v21 }
0x14f9   :  { %3034 = vpow2.f32 %v2444_v46  ;;  %2908 = vmatprep.subr.bf16.mxu1 %v3217_v6  ;;  %v3597_v46 = vld [vmem:[%s3826_s4 + $0x2] ss:$0 sm:$0xff] }
0x14fc   :  { %2910 = vmatpush3.bf16.msra.mxu1 %v3501_v24 }
0x14fd   :  { %2911 = vmatprep.subr.bf16.mxu1 %v3217_v6 }
0x1500   :  { %2913 = vmatpush3.bf16.msra.mxu1 %v3511_v26 }
0x1501   :  { %v3033_v10 = vpop.eup %3032  ;;  %2914 = vmatprep.subr.bf16.mxu1 %v3217_v6 }
0x1502   :  { %1175 = vrot.lane.b32.xlu0 %v3033_v10, %s3220_s15  ;;  %v2445_v10 = vld [vmem:[%s3826_s4 + $0x3] ss:$0 sm:$0xff] }
0x1503   :  { %v3035_v11 = vpop.eup %3034 }
0x1504   :  { %v1169_v12 = vadd.f32 1.0, %v3035_v11  ;;  %2916 = vmatpush3.bf16.msra.mxu1 %v3522_v29 }
0x1505   :  { %2923 = vmatprep.subr.bf16.mxu1 %v3217_v6 }
0x1506   :  { %3036 = vrcp.f32 %v1169_v12  ;;  %v3600_v12 = vadd.f32 %v3462_v49, %v2445_v10 }
0x1510   :  { %v3037_v13 = vpop.eup %3036 }
0x1511   :  { %v1173_v16 = vmul.f32 %v3037_v13, %v1078_v63  ;;  %v53_v63 = vld [vmem:[%s3824_s2 + $0x10] sm:$0xff] }
0x1512   :  { %v3575_v2 = vpack.c.bf16 %v54_v1, %v53_v63 }
0x1514   :  { %2922 = vmatpush3.bf16.msra.mxu0 %v3575_v2 }
0x1515   :  { %2935 = vmatprep.subr.bf16.mxu0 %v3217_v6 }
0x1574   :  { %v1176_v14 = vpop.permute.xlu0 %1175 }
0x1575   :  { %v1178_v15 = vmul.f32 %v3037_v13, %v1176_v14  ;;  %v3606_v14 = vadd.f32 %v2445_v10, %v3468_v54 }
0x1577   :  { %1180 = vrot.lane.b32.xlu1 %v1178_v15, %s3221_s16 }
0x15e9   :  { %v1181_v17 = vpop.permute.xlu1 %1180 }
0x15ea   :  { %v1183_v19 = vadd.f32 %v1181_v17, %v1173_v16  ;;  %v3610_v17 = vadd.f32 %v3466_v52, %v2445_v10 }
0x15ec   :  { %3038 = vtanh.f32 %v1183_v19 }
0x15f6   :  { %v3039_v28 = vpop.eup %3038 }
0x15f7   :  { %1186 = vrot.lane.b32.xlu0 %v3039_v28, %s3220_s15 }
0x1669   :  { %v1187_v30 = vpop.permute.xlu0 %1186 }
0x166a   :  { %v1189_v31 = vmul.f32 %v3037_v13, %v1187_v30  ;;  %v3603_v13 = vadd.f32 %v2445_v10, %v3464_v51  ;;  %v3619_v51 = vadd.f32 %v3471_v55, %v2445_v10 }
0x166c   :  { %1341 = vrot.lane.b32.xlu1 %v1189_v31, %s3220_s15 }
0x16de   :  { %v1342_v33 = vpop.permute.xlu1 %1341 }
0x16df   :  { %v1344_v34 = vsel %vm219_vm3, %v2454_v32, %v1342_v33 }
0x16e0   :  { %2752 = vmatmul.mubr.msk.f32.vlgmr.msra.gmra.mrb[16].mxu1 %vm1349_vm4, %v1344_v34 }
0x16e1   :  { %2925 = vmatpush3.bf16.msra.mxu1 %v3495_v21  ;;  %2781 = vmatprep.mubr.msk.f32.mxu1 %vm3218_vm2, %v3219_v22 }
0x16e2   :  { %2926 = vmatprep.subr.bf16.mxu1 %v3217_v6 }
0x16e5   :  { %2928 = vmatpush3.bf16.msra.mxu1 %v3501_v24 }
0x16e6   :  { %2929 = vmatprep.subr.bf16.mxu1 %v3217_v6 }
0x16e9   :  { %2931 = vmatpush3.bf16.msra.mxu1 %v3511_v26 }
0x16ea   :  { %2932 = vmatprep.subr.bf16.mxu1 %v3217_v6 }
0x16ed   :  { %2934 = vmatpush3.bf16.msra.mxu1 %v3522_v29 }
0x16ee   :  { %2953 = vmatprep.subr.bf16.mxu1 %v3217_v6 }
0x17b3   :  { %v1419_v36 = vpop.f32.mrb[16].mxu1 }
0x17b4   :  { %v1420_v37 = vadd.f32 %v3546_v35, %v1419_v36  ;;  %v2753_v38 = vpop.f32.mrb[17].mxu1 }
0x17b6   :  { %3040 = vtanh.f32 %v1420_v37  ;;  %v2457_v41 = vmul.f32 -1.442695, %v1420_v37 }
0x17b8   :  { %3042 = vpow2.f32 %v2457_v41 }
0x17c0   :  { %v3041_v39 = vpop.eup %3040 }
0x17c1   :  { %1432 = vrot.lane.b32.xlu0 %v3041_v39, %s3220_s15 }
0x17c2   :  { %v3043_v42 = vpop.eup %3042 }
0x17c3   :  { %v1426_v43 = vadd.f32 1.0, %v3043_v42 }
0x17c5   :  { %3044 = vrcp.f32 %v1426_v43 }
0x17cf   :  { %v3045_v45 = vpop.eup %3044 }
0x17d0   :  { %v1430_v40 = vmul.f32 %v3045_v45, %v1183_v19  ;;  %v3613_v19 = vadd.f32 %v2445_v10, %v3473_v56 }
0x1833   :  { %v1433_v47 = vpop.permute.xlu0 %1432 }
0x1834   :  { %v1435_v53 = vmul.f32 %v3045_v45, %v1433_v47 }
0x1836   :  { %1437 = vrot.lane.b32.xlu1 %v1435_v53, %s3221_s16 }
0x183a   :  { %1191 = vrot.lane.b32.xlu1 %v1189_v31, %s3221_s16 }
0x18a8   :  { %v1438_v50 = vpop.permute.xlu1 %1437 }
0x18a9   :  { %v3552_v57 = vadd.f32 %v1438_v50, %v1430_v40 }
0x18ab   :  { %3046 = vtanh.f32 %v3552_v57 }
0x18ac   :  { %v1192_v58 = vpop.permute.xlu1 %1191 }
0x18ad   :  { %1195 = vst.msk [vmem:[#allocation3 + $0x38] sm:$0xff] %vm219_vm3, %v1192_v58 }
0x18b4   :  { %v1203_v59 = vld [vmem:[#allocation3 + $0x38] sm:$0xff] }
0x18b5   :  { %v3047_v60 = vpop.eup %3046  ;;  %2733 = vmatmul.mubr.msk.f32.gmra.mrb[22].mxu0 %vm219_vm3, %v1203_v59 }
0x18b6   :  { %1443 = vrot.lane.b32.xlu0 %v3047_v60, %s3220_s15  ;;  %2762 = vmatprep.mubr.msk.f32.mxu0 %vm3218_vm2, %v3219_v22 }
0x1928   :  { %v1444_v3 = vpop.permute.xlu0 %1443 }
0x1929   :  { %v3580_v4 = vmul.f32 %v3045_v45, %v1444_v3 }
0x192b   :  { %1452 = vrot.lane.b32.xlu0 %v3580_v4, %s3221_s16 }
0x1988   :  { %v2734_v5 = vpop.f32.mrb[22].mxu0 }
0x1989   :  { %v1328_v8 = vpop.f32.mrb[23].mxu0  ;;  %v3626_v56 = vadd.f32 %v2734_v5, %v2445_v10 }
0x198a   :  { %v3624_v23 = vadd.f32 %v2445_v10, %v1328_v8 }
0x199d   :  { %v1453_v9 = vpop.permute.xlu0 %1452 }
0x199e   :  { %2763 = vmatmul.mubr.msk.f32.vlgmr.msra.gmra.mrb[24].mxu0 %vm219_vm3, %v1453_v9 }
0x199f   :  { %2937 = vmatpush3.bf16.msra.mxu0 %v3569_v0  ;;  %2792 = vmatprep.mubr.msk.f32.mxu0 %vm3218_vm2, %v3219_v22 }
0x19a0   :  { %2938 = vmatprep.subr.bf16.mxu0 %v3217_v6 }
0x19a3   :  { %2940 = vmatpush3.bf16.msra.mxu0 %v3575_v2 }
0x19a4   :  { %2941 = vmatprep.subr.bf16.mxu0 %v3217_v6 }
0x1a71   :  { %v1522_v11 = vpop.f32.mrb[24].mxu0 }
0x1a72   :  { %v1523_v15 = vadd.f32 %v3597_v46, %v1522_v11  ;;  %v2764_v16 = vpop.f32.mrb[25].mxu0 }
0x1a74   :  { %v1527_v48 = vadd.f32 %v1523_v15, %v3600_v12  ;;  %v1526_v49 = vadd.f32 %v1523_v15, %v3603_v13  ;;  %v1528_v7 = vadd.f32 %v1523_v15, %v3606_v14  ;;  %v1529_v54 = vadd.f32 %v1523_v15, %v3610_v17 }
0x1a75   :  { %v1530_v20 = vadd.f32 %v1523_v15, %v3613_v19  ;;  %v1531_v52 = vadd.f32 %v1523_v15, %v3619_v51  ;;  %v1532_v18 = vadd.f32 %v1523_v15, %v3624_v23  ;;  %v1533_v55 = vadd.f32 %v1523_v15, %v3626_v56 }
0x1a76   :  { %3048 = vtanh.f32 %v1527_v48 }
0x1a77   :  { %3050 = vtanh.f32 %v1526_v49 }
0x1a78   :  { %3052 = vtanh.f32 %v1528_v7 }
0x1a79   :  { %3054 = vtanh.f32 %v1529_v54 }
0x1a7a   :  { %3056 = vtanh.f32 %v1530_v20 }
0x1a7b   :  { %3058 = vtanh.f32 %v1531_v52 }
0x1a7c   :  { %3060 = vtanh.f32 %v1532_v18 }
0x1a7d   :  { %3062 = vtanh.f32 %v1533_v55 }
0x1a80   :  { %v3049_v44 = vpop.eup %3048 }
0x1a81   :  { %v3051_v27 = vpop.eup %3050  ;;  %v1547_v28 = vmul.f32 %v3049_v44, %v3633_v25 }
0x1a82   :  { %v3053_v30 = vpop.eup %3052  ;;  %v1546_v31 = vmul.f32 %v3051_v27, %v3633_v25 }
0x1a83   :  { %v3055_v32 = vpop.eup %3054  ;;  %v1557_v33 = vsel %vm219_vm3, %v1547_v28, 0.0  ;;  %v1548_v34 = vmul.f32 %v3053_v30, %v3633_v25 }
0x1a84   :  { %v3057_v36 = vpop.eup %3056  ;;  %1558 = vadd.xlane.f32.xlu0 %v1557_v33  ;;  %v1554_v37 = vsel %vm219_vm3, %v1546_v31, 0.0  ;;  %v1549_v38 = vmul.f32 %v3055_v32, %v3633_v25 }
0x1a85   :  { %v3059_v39 = vpop.eup %3058  ;;  %1555 = vadd.xlane.f32.xlu1 %v1554_v37  ;;  %v1560_v41 = vsel %vm219_vm3, %v1548_v34, 0.0  ;;  %v1550_v42 = vmul.f32 %v3057_v36, %v3633_v25 }
0x1a86   :  { %v3061_v43 = vpop.eup %3060  ;;  %v1563_v45 = vsel %vm219_vm3, %v1549_v38, 0.0  ;;  %v1551_v47 = vmul.f32 %v3059_v39, %v3633_v25 }
0x1a87   :  { %v3063_v53 = vpop.eup %3062  ;;  %v1566_v40 = vsel %vm219_vm3, %v1550_v42, 0.0  ;;  %v1552_v50 = vmul.f32 %v3061_v43, %v3633_v25 }
0x1a88   :  { %1561 = vadd.xlane.f32.xlu0 %v1560_v41  ;;  %v1569_v58 = vsel %vm219_vm3, %v1551_v47, 0.0  ;;  %v1553_v59 = vmul.f32 %v3063_v53, %v3633_v25 }
0x1a89   :  { %1564 = vadd.xlane.f32.xlu1 %v1563_v45  ;;  %v1572_v60 = vsel %vm219_vm3, %v1552_v50, 0.0 }
0x1a8a   :  { %v1575_v61 = vsel %vm219_vm3, %v1553_v59, 0.0 }
0x1a8c   :  { %1567 = vadd.xlane.f32.xlu0 %v1566_v40 }
0x1a8d   :  { %1570 = vadd.xlane.f32.xlu1 %v1569_v58 }
0x1a90   :  { %1573 = vadd.xlane.f32.xlu0 %v1572_v60 }
0x1a91   :  { %1576 = vadd.xlane.f32.xlu1 %v1575_v61 }
0x1aa6   :  { %1648 = vrot.lane.b32.xlu0 %v3580_v4, %s3220_s15 }
0x1b11   :  { %v1559_v62 = vpop.xlane.xlu0 %1558 }
0x1b12   :  { %v1556_v63 = vpop.xlane.xlu1 %1555 }
0x1b15   :  { %v1562_v1 = vpop.xlane.xlu0 %1561 }
0x1b16   :  { %v1565_v3 = vpop.xlane.xlu1 %1564 }
0x1b19   :  { %v1568_v5 = vpop.xlane.xlu0 %1567 }
0x1b1a   :  { %v1571_v8 = vpop.xlane.xlu1 %1570  ;;  %v1578_v9 = vmax.f32 %v1556_v63, %v1568_v5 }
0x1b1b   :  { %v1579_v10 = vmax.f32 %v1559_v62, %v1571_v8 }
0x1b1d   :  { %v1574_v11 = vpop.xlane.xlu0 %1573  ;;  %v1582_v49 = vmax.f32 %v1578_v9, %v1579_v10 }
0x1b1e   :  { %v1580_v15 = vmax.f32 %v1562_v1, %v1574_v11  ;;  %v1577_v16 = vpop.xlane.xlu1 %1576 }
0x1b1f   :  { %v1581_v48 = vmax.f32 %v1565_v3, %v1577_v16 }
0x1b21   :  { %v1583_v7 = vmax.f32 %v1580_v15, %v1581_v48 }
0x1b23   :  { %v1584_v54 = vmax.f32 %v1582_v49, %v1583_v7 }
0x1b25   :  { %v1585_v20 = vsub.f32 %v1556_v63, %v1584_v54  ;;  %v1586_v52 = vsub.f32 %v1559_v62, %v1584_v54  ;;  %v1587_v18 = vsub.f32 %v1562_v1, %v1584_v54  ;;  %v1588_v55 = vsub.f32 %v1565_v3, %v1584_v54 }
0x1b26   :  { %v1589_v27 = vsub.f32 %v1568_v5, %v1584_v54  ;;  %v1590_v30 = vsub.f32 %v1571_v8, %v1584_v54  ;;  %v1591_v32 = vsub.f32 %v1574_v11, %v1584_v54  ;;  %v1592_v34 = vsub.f32 %v1577_v16, %v1584_v54 }
0x1b27   :  { %v1593_v4 = vmul.f32 1.442695, %v1585_v20  ;;  %v1595_v44 = vmul.f32 1.442695, %v1586_v52  ;;  %v1597_v28 = vmul.f32 1.442695, %v1587_v18 }
0x1b28   :  { %v1599_v31 = vmul.f32 1.442695, %v1588_v55  ;;  %v1601_v33 = vmul.f32 1.442695, %v1589_v27  ;;  %v1603_v36 = vmul.f32 1.442695, %v1590_v30 }
0x1b29   :  { %3064 = vpow2.f32 %v1593_v4  ;;  %v1605_v37 = vmul.f32 1.442695, %v1591_v32  ;;  %v1607_v38 = vmul.f32 1.442695, %v1592_v34 }
0x1b2a   :  { %3066 = vpow2.f32 %v1595_v44 }
0x1b2b   :  { %3068 = vpow2.f32 %v1597_v28 }
0x1b2c   :  { %3070 = vpow2.f32 %v1599_v31 }
0x1b2d   :  { %3072 = vpow2.f32 %v1601_v33 }
0x1b2e   :  { %3074 = vpow2.f32 %v1603_v36 }
0x1b2f   :  { %3076 = vpow2.f32 %v1605_v37 }
0x1b30   :  { %3078 = vpow2.f32 %v1607_v38 }
0x1b33   :  { %v3065_v39 = vpop.eup %3064 }
0x1b34   :  { %v3067_v41 = vpop.eup %3066 }
0x1b35   :  { %v1609_v42 = vadd.f32 %v3067_v41, %v3065_v39  ;;  %v3069_v43 = vpop.eup %3068 }
0x1b36   :  { %v3071_v47 = vpop.eup %3070 }
0x1b37   :  { %v1610_v45 = vadd.f32 %v3069_v43, %v1609_v42  ;;  %v3073_v40 = vpop.eup %3072 }
0x1b38   :  { %v3075_v58 = vpop.eup %3074 }
0x1b39   :  { %v1611_v53 = vadd.f32 %v3071_v47, %v1610_v45  ;;  %v3077_v60 = vpop.eup %3076 }
0x1b3a   :  { %v3079_v62 = vpop.eup %3078 }
0x1b3b   :  { %v1612_v50 = vadd.f32 %v3073_v40, %v1611_v53 }
0x1b3d   :  { %v1613_v59 = vadd.f32 %v3075_v58, %v1612_v50 }
0x1b3f   :  { %v1614_v61 = vadd.f32 %v3077_v60, %v1613_v59 }
0x1b41   :  { %v1615_v63 = vadd.f32 %v3079_v62, %v1614_v61 }
0x1b43   :  { %3080 = vrcp.f32 %v1615_v63 }
0x1b4d   :  { %v3081_v1 = vpop.eup %3080 }
0x1b4e   :  { %v1617_v3 = vmul.f32 %v3081_v1, %v3065_v39  ;;  %v1618_v5 = vmul.f32 %v3081_v1, %v3067_v41  ;;  %v1619_v8 = vmul.f32 %v3081_v1, %v3069_v43  ;;  %v1620_v9 = vmul.f32 %v3081_v1, %v3071_v47  ;;  %v1649_v43 = vpop.permute.xlu0 %1648 }
0x1b4f   :  { %v1621_v10 = vmul.f32 %v3081_v1, %v3073_v40  ;;  %v1622_v48 = vmul.f32 %v3081_v1, %v3075_v58  ;;  %v1623_v52 = vmul.f32 %v3081_v1, %v3077_v60  ;;  %v1624_v44 = vmul.f32 %v3081_v1, %v3079_v62 }
0x1b50   :  { %v1625_v11 = vmul.f32 %v1617_v3, %v3603_v13  ;;  %v1626_v15 = vmul.f32 %v1618_v5, %v3600_v12  ;;  %v1627_v16 = vmul.f32 %v1619_v8, %v3606_v14  ;;  %v1628_v49 = vmul.f32 %v1620_v9, %v3610_v17 }
0x1b51   :  { %v1629_v18 = vmul.f32 %v1621_v10, %v3613_v19  ;;  %v1630_v27 = vmul.f32 %v1622_v48, %v3619_v51  ;;  %v1631_v31 = vmul.f32 %v1623_v52, %v3624_v23  ;;  %v1632_v34 = vmul.f32 %v1624_v44, %v3626_v56 }
0x1b52   :  { %v1633_v7 = vsel %vm219_vm3, %v1625_v11, 0.0  ;;  %v1634_v54 = vsel %vm219_vm3, %v1626_v15, 0.0  ;;  %v1636_v55 = vsel %vm219_vm3, %v1627_v16, 0.0  ;;  %v1638_v28 = vsel %vm219_vm3, %v1628_v49, 0.0 }
0x1b53   :  { %v1635_v20 = vadd.f32 %v1634_v54, %v1633_v7  ;;  %v1640_v32 = vsel %vm219_vm3, %v1629_v18, 0.0  ;;  %v1642_v36 = vsel %vm219_vm3, %v1630_v27, 0.0  ;;  %v1644_v38 = vsel %vm219_vm3, %v1631_v31, 0.0 }
0x1b54   :  { %v1646_v41 = vsel %vm219_vm3, %v1632_v34, 0.0 }
0x1b55   :  { %v1637_v4 = vadd.f32 %v1636_v55, %v1635_v20 }
0x1b57   :  { %v1639_v30 = vadd.f32 %v1638_v28, %v1637_v4 }
0x1b59   :  { %v1641_v33 = vadd.f32 %v1640_v32, %v1639_v30 }
0x1b5b   :  { %v1643_v37 = vadd.f32 %v1642_v36, %v1641_v33 }
0x1b5d   :  { %v1645_v39 = vadd.f32 %v1644_v38, %v1643_v37 }
0x1b5f   :  { %v1647_v42 = vadd.f32 %v1646_v41, %v1645_v39 }
0x1b61   :  { %v1651_v45 = vsel %vm219_vm3, %v1647_v42, %v1649_v43 }
0x1b62   :  { %2782 = vmatmul.mubr.msk.f32.vlgmr.msra.gmra.mrb[18].mxu1 %vm1349_vm4, %v1651_v45 }
0x1b63   :  { %2955 = vmatpush3.bf16.msra.mxu1 %v3569_v0  ;;  %2822 = vmatprep.mubr.msk.f32.mxu1 %vm3218_vm2, %v3219_v22 }
0x1b64   :  { %2956 = vmatprep.subr.bf16.mxu1 %v3217_v6 }
0x1b67   :  { %2958 = vmatpush3.bf16.msra.mxu1 %v3575_v2 }
0x1b68   :  { %2959 = vmatprep.subr.bf16.mxu1 %v3217_v6 }
0x1c35   :  { %v1721_v47 = vpop.f32.mrb[18].mxu1 }
0x1c36   :  { %v1722_v53 = vadd.f32 %v3546_v35, %v1721_v47  ;;  %v2783_v40 = vpop.f32.mrb[19].mxu1 }
0x1c38   :  { %3082 = vtanh.f32 %v1722_v53  ;;  %v2462_v58 = vmul.f32 -1.442695, %v1722_v53 }
0x1c3a   :  { %3084 = vpow2.f32 %v2462_v58 }
0x1c42   :  { %v3083_v50 = vpop.eup %3082 }
0x1c43   :  { %1734 = vrot.lane.b32.xlu1 %v3083_v50, %s3220_s15 }
0x1c44   :  { %v3085_v0 = vpop.eup %3084 }
0x1c45   :  { %v1728_v59 = vadd.f32 1.0, %v3085_v0 }
0x1c47   :  { %3086 = vrcp.f32 %v1728_v59 }
0x1c51   :  { %v3087_v60 = vpop.eup %3086 }
0x1c52   :  { %v1732_v2 = vmul.f32 %v3087_v60, %v3552_v57 }
0x1cb5   :  { %v1735_v61 = vpop.permute.xlu1 %1734 }
0x1cb6   :  { %v1737_v62 = vmul.f32 %v3087_v60, %v1735_v61 }
0x1cb8   :  { %1739 = vrot.lane.b32.xlu1 %v1737_v62, %s3221_s16 }
0x1d2a   :  { %v1740_v63 = vpop.permute.xlu1 %1739 }
0x1d2b   :  { %v3681_v1 = vadd.f32 %v1740_v63, %v1732_v2 }
0x1d2d   :  { %3088 = vtanh.f32 %v3681_v1 }
0x1d37   :  { %v3089_v3 = vpop.eup %3088 }
0x1d38   :  { %1745 = vrot.lane.b32.xlu0 %v3089_v3, %s3220_s15 }
0x1daa   :  { %v1746_v5 = vpop.permute.xlu0 %1745 }
0x1dab   :  { %v3685_v8 = vmul.f32 %v3087_v60, %v1746_v5 }
0x1dad   :  { %1750 = vrot.lane.b32.xlu1 %v3685_v8, %s3221_s16 }
0x1e1f   :  { %v1751_v9 = vpop.permute.xlu1 %1750 }
0x1e20   :  { %2793 = vmatmul.mubr.msk.f32.vlgmr.msra.gmra.mrb[26].mxu0 %vm219_vm3, %v1751_v9 }
0x1e21   :  { %2943 = vmatpush3.bf16.msra.mxu0 %v3495_v21  ;;  %2811 = vmatprep.mubr.msk.f32.mxu0 %vm3218_vm2, %v3219_v22 }
0x1e22   :  { %2944 = vmatprep.subr.bf16.mxu0 %v3217_v6 }
0x1e25   :  { %2946 = vmatpush3.bf16.msra.mxu0 %v3501_v24 }
0x1e26   :  { %2947 = vmatprep.subr.bf16.mxu0 %v3217_v6 }
0x1e29   :  { %2949 = vmatpush3.bf16.msra.mxu0 %v3511_v26 }
0x1e2a   :  { %2950 = vmatprep.subr.bf16.mxu0 %v3217_v6 }
0x1e2d   :  { %2952 = vmatpush3.bf16.msra.mxu0 %v3522_v29 }
0x1e2e   :  { %2836 = vmatprep.subr.mxu0 %v3219_v22 }
0x1ef3   :  { %v1820_v57 = vpop.f32.mrb[26].mxu0 }
0x1ef4   :  { %v1821_v21 = vadd.f32 %v3597_v46, %v1820_v57  ;;  %v2794_v10 = vpop.f32.mrb[27].mxu0 }
0x1ef6   :  { %v1825_v11 = vadd.f32 %v1821_v21, %v3600_v12  ;;  %v1824_v15 = vadd.f32 %v1821_v21, %v3603_v13  ;;  %v1828_v24 = vadd.f32 %v1821_v21, %v3613_v19  ;;  %v1826_v16 = vadd.f32 %v1821_v21, %v3606_v14 }
0x1ef7   :  { %v1830_v26 = vadd.f32 %v1821_v21, %v3624_v23  ;;  %v1827_v29 = vadd.f32 %v1821_v21, %v3610_v17  ;;  %v1829_v48 = vadd.f32 %v1821_v21, %v3619_v51  ;;  %v1831_v49 = vadd.f32 %v1821_v21, %v3626_v56 }
0x1ef8   :  { %3090 = vtanh.f32 %v1825_v11 }
0x1ef9   :  { %3092 = vtanh.f32 %v1824_v15 }
0x1efa   :  { %3094 = vtanh.f32 %v1828_v24 }
0x1efb   :  { %3096 = vtanh.f32 %v1826_v16 }
0x1efc   :  { %3098 = vtanh.f32 %v1830_v26 }
0x1efd   :  { %3100 = vtanh.f32 %v1827_v29 }
0x1efe   :  { %3102 = vtanh.f32 %v1829_v48 }
0x1eff   :  { %3104 = vtanh.f32 %v1831_v49 }
0x1f02   :  { %v3091_v7 = vpop.eup %3090 }
0x1f03   :  { %v3093_v54 = vpop.eup %3092  ;;  %v1841_v20 = vmul.f32 %v3091_v7, %v3633_v25 }
0x1f04   :  { %v3095_v52 = vpop.eup %3094  ;;  %v1840_v18 = vmul.f32 %v3093_v54, %v3633_v25 }
0x1f05   :  { %v3097_v55 = vpop.eup %3096  ;;  %v1851_v4 = vsel %vm219_vm3, %v1841_v20, 0.0  ;;  %v1844_v44 = vmul.f32 %v3095_v52, %v3633_v25 }
0x1f06   :  { %v3099_v27 = vpop.eup %3098  ;;  %1852 = vadd.xlane.f32.xlu1 %v1851_v4  ;;  %v1848_v28 = vsel %vm219_vm3, %v1840_v18, 0.0  ;;  %v1842_v30 = vmul.f32 %v3097_v55, %v3633_v25 }
0x1f07   :  { %v3101_v31 = vpop.eup %3100  ;;  %1849 = vadd.xlane.f32.xlu0 %v1848_v28  ;;  %v1860_v32 = vsel %vm219_vm3, %v1844_v44, 0.0  ;;  %v1846_v33 = vmul.f32 %v3099_v27, %v3633_v25 }
0x1f08   :  { %v1854_v34 = vsel %vm219_vm3, %v1842_v30, 0.0  ;;  %v1843_v36 = vmul.f32 %v3101_v31, %v3633_v25  ;;  %v3103_v37 = vpop.eup %3102 }
0x1f09   :  { %v1866_v38 = vsel %vm219_vm3, %v1846_v33, 0.0  ;;  %v1845_v41 = vmul.f32 %v3103_v37, %v3633_v25  ;;  %v3105_v42 = vpop.eup %3104 }
0x1f0a   :  { %1861 = vadd.xlane.f32.xlu1 %v1860_v32  ;;  %v1857_v39 = vsel %vm219_vm3, %v1843_v36, 0.0  ;;  %v1847_v45 = vmul.f32 %v3105_v42, %v3633_v25 }
0x1f0b   :  { %1855 = vadd.xlane.f32.xlu0 %v1854_v34  ;;  %v1863_v43 = vsel %vm219_vm3, %v1845_v41, 0.0 }
0x1f0c   :  { %v1869_v47 = vsel %vm219_vm3, %v1847_v45, 0.0 }
0x1f0e   :  { %1867 = vadd.xlane.f32.xlu1 %v1866_v38 }
0x1f0f   :  { %1858 = vadd.xlane.f32.xlu0 %v1857_v39 }
0x1f13   :  { %1864 = vadd.xlane.f32.xlu0 %v1863_v43 }
0x1f17   :  { %1870 = vadd.xlane.f32.xlu0 %v1869_v47 }
0x1f1f   :  { %1942 = vrot.lane.b32.xlu1 %v3685_v8, %s3220_s15 }
0x1f93   :  { %v1853_v40 = vpop.xlane.xlu1 %1852 }
0x1f94   :  { %v1850_v53 = vpop.xlane.xlu0 %1849 }
0x1f97   :  { %v1862_v58 = vpop.xlane.xlu1 %1861 }
0x1f98   :  { %v1856_v50 = vpop.xlane.xlu0 %1855  ;;  %v1872_v2 = vmax.f32 %v1850_v53, %v1862_v58 }
0x1f9b   :  { %v1868_v60 = vpop.xlane.xlu1 %1867 }
0x1f9c   :  { %v1859_v0 = vpop.xlane.xlu0 %1858  ;;  %v1874_v63 = vmax.f32 %v1856_v50, %v1868_v60 }
0x1fa0   :  { %v1865_v59 = vpop.xlane.xlu0 %1864 }
0x1fa1   :  { %v1873_v61 = vmax.f32 %v1853_v40, %v1865_v59 }
0x1fa3   :  { %v1876_v5 = vmax.f32 %v1872_v2, %v1873_v61 }
0x1fa4   :  { %v1871_v62 = vpop.xlane.xlu0 %1870 }
0x1fa5   :  { %v1875_v3 = vmax.f32 %v1859_v0, %v1871_v62 }
0x1fa7   :  { %v1877_v9 = vmax.f32 %v1874_v63, %v1875_v3 }
0x1fa9   :  { %v1878_v57 = vmax.f32 %v1876_v5, %v1877_v9 }
0x1fab   :  { %v1879_v21 = vsub.f32 %v1850_v53, %v1878_v57  ;;  %v1880_v10 = vsub.f32 %v1853_v40, %v1878_v57  ;;  %v1881_v11 = vsub.f32 %v1856_v50, %v1878_v57  ;;  %v1882_v15 = vsub.f32 %v1859_v0, %v1878_v57 }
0x1fac   :  { %v1883_v16 = vsub.f32 %v1862_v58, %v1878_v57  ;;  %v1884_v29 = vsub.f32 %v1865_v59, %v1878_v57  ;;  %v1885_v49 = vsub.f32 %v1868_v60, %v1878_v57  ;;  %v1886_v54 = vsub.f32 %v1871_v62, %v1878_v57 }
0x1fad   :  { %v1887_v8 = vmul.f32 1.442695, %v1879_v21  ;;  %v1889_v24 = vmul.f32 1.442695, %v1880_v10  ;;  %v1891_v26 = vmul.f32 1.442695, %v1881_v11 }
0x1fae   :  { %v1893_v48 = vmul.f32 1.442695, %v1882_v15  ;;  %v1895_v7 = vmul.f32 1.442695, %v1883_v16  ;;  %v1897_v20 = vmul.f32 1.442695, %v1884_v29 }
0x1faf   :  { %3106 = vpow2.f32 %v1887_v8  ;;  %v1899_v52 = vmul.f32 1.442695, %v1885_v49  ;;  %v1901_v18 = vmul.f32 1.442695, %v1886_v54 }
0x1fb0   :  { %3108 = vpow2.f32 %v1889_v24 }
0x1fb1   :  { %3110 = vpow2.f32 %v1891_v26 }
0x1fb2   :  { %3112 = vpow2.f32 %v1893_v48 }
0x1fb3   :  { %3114 = vpow2.f32 %v1895_v7 }
0x1fb4   :  { %3116 = vpow2.f32 %v1897_v20  ;;  %v1943_v20 = vpop.permute.xlu1 %1942 }
0x1fb5   :  { %3118 = vpow2.f32 %v1899_v52 }
0x1fb6   :  { %3120 = vpow2.f32 %v1901_v18 }
0x1fb9   :  { %v3107_v55 = vpop.eup %3106 }
0x1fba   :  { %v3109_v4 = vpop.eup %3108 }
0x1fbb   :  { %v1903_v44 = vadd.f32 %v3109_v4, %v3107_v55  ;;  %v3111_v27 = vpop.eup %3110 }
0x1fbc   :  { %v3113_v30 = vpop.eup %3112 }
0x1fbd   :  { %v1904_v28 = vadd.f32 %v3111_v27, %v1903_v44  ;;  %v3115_v32 = vpop.eup %3114 }
0x1fbe   :  { %v3117_v34 = vpop.eup %3116 }
0x1fbf   :  { %v1905_v31 = vadd.f32 %v3113_v30, %v1904_v28  ;;  %v3119_v37 = vpop.eup %3118 }
0x1fc0   :  { %v3121_v39 = vpop.eup %3120 }
0x1fc1   :  { %v1906_v33 = vadd.f32 %v3115_v32, %v1905_v31 }
0x1fc3   :  { %v1907_v36 = vadd.f32 %v3117_v34, %v1906_v33 }
0x1fc5   :  { %v1908_v38 = vadd.f32 %v3119_v37, %v1907_v36 }
0x1fc7   :  { %v1909_v41 = vadd.f32 %v3121_v39, %v1908_v38 }
0x1fc9   :  { %3122 = vrcp.f32 %v1909_v41 }
0x1fd3   :  { %v3123_v42 = vpop.eup %3122 }
0x1fd4   :  { %v1911_v43 = vmul.f32 %v3123_v42, %v3107_v55  ;;  %v1912_v45 = vmul.f32 %v3123_v42, %v3109_v4  ;;  %v1913_v47 = vmul.f32 %v3123_v42, %v3111_v27  ;;  %v1914_v53 = vmul.f32 %v3123_v42, %v3113_v30 }
0x1fd5   :  { %v1915_v40 = vmul.f32 %v3123_v42, %v3115_v32  ;;  %v1916_v59 = vmul.f32 %v3123_v42, %v3117_v34  ;;  %v1917_v63 = vmul.f32 %v3123_v42, %v3119_v37  ;;  %v1918_v57 = vmul.f32 %v3123_v42, %v3121_v39 }
0x1fd6   :  { %v1919_v50 = vmul.f32 %v1911_v43, %v3603_v13  ;;  %v1920_v58 = vmul.f32 %v1912_v45, %v3600_v12  ;;  %v1921_v0 = vmul.f32 %v1913_v47, %v3606_v14  ;;  %v1922_v60 = vmul.f32 %v1914_v53, %v3610_v17 }
0x1fd7   :  { %v1923_v3 = vmul.f32 %v1915_v40, %v3613_v19  ;;  %v1924_v21 = vmul.f32 %v1916_v59, %v3619_v51  ;;  %v1925_v15 = vmul.f32 %v1917_v63, %v3624_v23  ;;  %v1926_v16 = vmul.f32 %v1918_v57, %v3626_v56 }
0x1fd8   :  { %v1927_v61 = vsel %vm219_vm3, %v1919_v50, 0.0  ;;  %v1928_v62 = vsel %vm219_vm3, %v1920_v58, 0.0  ;;  %v1930_v5 = vsel %vm219_vm3, %v1921_v0, 0.0  ;;  %v1932_v10 = vsel %vm219_vm3, %v1922_v60, 0.0 }
0x1fd9   :  { %v1929_v2 = vadd.f32 %v1928_v62, %v1927_v61  ;;  %v1934_v8 = vsel %vm219_vm3, %v1923_v3, 0.0  ;;  %v1936_v26 = vsel %vm219_vm3, %v1924_v21, 0.0  ;;  %v1938_v48 = vsel %vm219_vm3, %v1925_v15, 0.0 }
0x1fda   :  { %v1940_v7 = vsel %vm219_vm3, %v1926_v16, 0.0 }
0x1fdb   :  { %v1931_v9 = vadd.f32 %v1930_v5, %v1929_v2 }
0x1fdd   :  { %v1933_v11 = vadd.f32 %v1932_v10, %v1931_v9 }
0x1fdf   :  { %v1935_v24 = vadd.f32 %v1934_v8, %v1933_v11 }
0x1fe1   :  { %v1937_v29 = vadd.f32 %v1936_v26, %v1935_v24 }
0x1fe3   :  { %v1939_v49 = vadd.f32 %v1938_v48, %v1937_v29 }
0x1fe5   :  { %v1941_v54 = vadd.f32 %v1940_v7, %v1939_v49 }
0x1fe7   :  { %v1945_v52 = vsel %vm219_vm3, %v1941_v54, %v1943_v20  ;;  %v59_v20 = vld [vmem:[#allocation4] sm:$0xff] }
0x1fe8   :  { %2812 = vmatmul.mubr.msk.f32.vlgmr.msra.gmra.mrb[28].mxu0 %vm1349_vm4, %v1945_v52  ;;  %v60_v52 = vld [vmem:[#allocation4 + $0x8] sm:$0xff] }
0x1fe9   :  { %2838 = vmatprep.mubr.msk.f32.mxu0 %vm3218_vm2, %v3219_v22 }
0x20bb   :  { %v2015_v18 = vpop.f32.mrb[28].mxu0 }
0x20bc   :  { %v2016_v55 = vadd.f32 %v3546_v35, %v2015_v18  ;;  %v2813_v4 = vpop.f32.mrb[29].mxu0  ;;  %v61_v18 = vld [vmem:[#allocation4 + $0x10] sm:$0xff] }
0x20bd   :  { %v62_v4 = vld [vmem:[#allocation4 + $0x18] sm:$0xff] }
0x20be   :  { %3124 = vtanh.f32 %v2016_v55  ;;  %v2465_v27 = vmul.f32 -1.442695, %v2016_v55  ;;  %v2960_v55 = vpack.c.bf16 %v60_v52, %v59_v20 }
0x20c0   :  { %3126 = vpow2.f32 %v2465_v27 }
0x20c8   :  { %v3125_v44 = vpop.eup %3124 }
0x20c9   :  { %2028 = vrot.lane.b32.xlu0 %v3125_v44, %s3220_s15  ;;  %v2963_v44 = vpack.c.bf16 %v62_v4, %v61_v18 }
0x20ca   :  { %v3127_v28 = vpop.eup %3126 }
0x20cb   :  { %v2022_v30 = vadd.f32 1.0, %v3127_v28 }
0x20cd   :  { %3128 = vrcp.f32 %v2022_v30 }
0x20d7   :  { %v3129_v31 = vpop.eup %3128 }
0x20d8   :  { %v2026_v34 = vmul.f32 %v3129_v31, %v3681_v1 }
0x213b   :  { %v2029_v32 = vpop.permute.xlu0 %2028 }
0x213c   :  { %v2031_v33 = vmul.f32 %v3129_v31, %v2029_v32 }
0x213e   :  { %2033 = vrot.lane.b32.xlu1 %v2031_v33, %s3221_s16 }
0x21b0   :  { %v2034_v36 = vpop.permute.xlu1 %2033 }
0x21b1   :  { %v2036_v37 = vadd.f32 %v2034_v36, %v2026_v34 }
0x21b3   :  { %3130 = vtanh.f32 %v2036_v37 }
0x21bd   :  { %v3131_v35 = vpop.eup %3130 }
0x21be   :  { %2039 = vrot.lane.b32.xlu1 %v3131_v35, %s3220_s15 }
0x2230   :  { %v2040_v38 = vpop.permute.xlu1 %2039 }
0x2231   :  { %v2042_v39 = vmul.f32 %v3129_v31, %v2040_v38 }
0x2233   :  { %2044 = vrot.lane.b32.xlu0 %v2042_v39, %s3221_s16 }
0x22a5   :  { %v2045_v41 = vpop.permute.xlu0 %2044 }
0x22a6   :  { %2823 = vmatmul.mubr.msk.f32.vlgmr.msra.gmra.mrb[20].mxu1 %vm219_vm3, %v2045_v41 }
0x22a7   :  { %2833 = vmatprep.mubr.msk.f32.mxu1 %vm3218_vm2, %v3219_v22  ;;  %2961 = vmatpush3.bf16.msra.mxu1 %v2960_v55 }
0x22a8   :  { %2962 = vmatprep.subr.bf16.mxu1 %v3217_v6 }
0x22ab   :  { %2964 = vmatpush3.bf16.msra.mxu1 %v2963_v44 }
0x2379   :  { %v2114_v42 = vpop.f32.mrb[20].mxu1 }
0x237a   :  { %v2115_v43 = vadd.f32 %v3597_v46, %v2114_v42  ;;  %v2824_v1 = vpop.f32.mrb[21].mxu1 }
0x237c   :  { %v2119_v45 = vadd.f32 %v2115_v43, %v3600_v12  ;;  %v2118_v47 = vadd.f32 %v2115_v43, %v3603_v13  ;;  %v2120_v53 = vadd.f32 %v2115_v43, %v3606_v14  ;;  %v2121_v40 = vadd.f32 %v2115_v43, %v3610_v17 }
0x237d   :  { %v2122_v50 = vadd.f32 %v2115_v43, %v3613_v19  ;;  %v2123_v58 = vadd.f32 %v2115_v43, %v3619_v51  ;;  %v2124_v22 = vadd.f32 %v2115_v43, %v3624_v23  ;;  %v2125_v46 = vadd.f32 %v2115_v43, %v3626_v56 }
0x237e   :  { %3132 = vtanh.f32 %v2119_v45 }
0x237f   :  { %3134 = vtanh.f32 %v2118_v47 }
0x2380   :  { %3136 = vtanh.f32 %v2120_v53 }
0x2381   :  { %3138 = vtanh.f32 %v2121_v40 }
0x2382   :  { %3140 = vtanh.f32 %v2122_v50 }
0x2383   :  { %3142 = vtanh.f32 %v2123_v58 }
0x2384   :  { %3144 = vtanh.f32 %v2124_v22 }
0x2385   :  { %3146 = vtanh.f32 %v2125_v46 }
0x2388   :  { %v3133_v0 = vpop.eup %3132 }
0x2389   :  { %v3135_v59 = vpop.eup %3134  ;;  %v2135_v60 = vmul.f32 %v3133_v0, %v3633_v25 }
0x238a   :  { %v3137_v61 = vpop.eup %3136  ;;  %v2134_v62 = vmul.f32 %v3135_v59, %v3633_v25 }
0x238b   :  { %v3139_v2 = vpop.eup %3138  ;;  %v2145_v63 = vsel %vm219_vm3, %v2135_v60, 0.0  ;;  %v2136_v3 = vmul.f32 %v3137_v61, %v3633_v25 }
0x238c   :  { %v3141_v5 = vpop.eup %3140  ;;  %2146 = vadd.xlane.f32.xlu0 %v2145_v63  ;;  %v2142_v9 = vsel %vm219_vm3, %v2134_v62, 0.0  ;;  %v2137_v57 = vmul.f32 %v3139_v2, %v3633_v25 }
0x238d   :  { %v3143_v21 = vpop.eup %3142  ;;  %2143 = vadd.xlane.f32.xlu1 %v2142_v9  ;;  %v2148_v10 = vsel %vm219_vm3, %v2136_v3, 0.0  ;;  %v2138_v11 = vmul.f32 %v3141_v5, %v3633_v25 }
0x238e   :  { %v3145_v15 = vpop.eup %3144  ;;  %v2151_v8 = vsel %vm219_vm3, %v2137_v57, 0.0  ;;  %v2139_v24 = vmul.f32 %v3143_v21, %v3633_v25 }
0x238f   :  { %v3147_v16 = vpop.eup %3146  ;;  %v2154_v26 = vsel %vm219_vm3, %v2138_v11, 0.0  ;;  %v2140_v29 = vmul.f32 %v3145_v15, %v3633_v25 }
0x2390   :  { %2149 = vadd.xlane.f32.xlu0 %v2148_v10  ;;  %v2157_v48 = vsel %vm219_vm3, %v2139_v24, 0.0  ;;  %v2141_v49 = vmul.f32 %v3147_v16, %v3633_v25 }
0x2391   :  { %2152 = vadd.xlane.f32.xlu1 %v2151_v8  ;;  %v2160_v7 = vsel %vm219_vm3, %v2140_v29, 0.0 }
0x2392   :  { %v2163_v54 = vsel %vm219_vm3, %v2141_v49, 0.0 }
0x2394   :  { %2155 = vadd.xlane.f32.xlu0 %v2154_v26 }
0x2395   :  { %2158 = vadd.xlane.f32.xlu1 %v2157_v48 }
0x2398   :  { %2161 = vadd.xlane.f32.xlu0 %v2160_v7 }
0x2399   :  { %2164 = vadd.xlane.f32.xlu1 %v2163_v54 }
0x2419   :  { %v2147_v27 = vpop.xlane.xlu0 %2146 }
0x241a   :  { %v2144_v28 = vpop.xlane.xlu1 %2143 }
0x241d   :  { %v2150_v25 = vpop.xlane.xlu0 %2149 }
0x241e   :  { %v2153_v30 = vpop.xlane.xlu1 %2152 }
0x2421   :  { %v2156_v31 = vpop.xlane.xlu0 %2155 }
0x2422   :  { %v2159_v32 = vpop.xlane.xlu1 %2158  ;;  %v2166_v33 = vmax.f32 %v2144_v28, %v2156_v31 }
0x2423   :  { %v2167_v34 = vmax.f32 %v2147_v27, %v2159_v32 }
0x2425   :  { %v2162_v36 = vpop.xlane.xlu0 %2161  ;;  %v2170_v39 = vmax.f32 %v2166_v33, %v2167_v34 }
0x2426   :  { %v2168_v37 = vmax.f32 %v2150_v25, %v2162_v36  ;;  %v2165_v35 = vpop.xlane.xlu1 %2164 }
0x2427   :  { %v2169_v38 = vmax.f32 %v2153_v30, %v2165_v35 }
0x2429   :  { %v2171_v41 = vmax.f32 %v2168_v37, %v2169_v38 }
0x242b   :  { %v2172_v42 = vmax.f32 %v2170_v39, %v2171_v41 }
0x242d   :  { %v2173_v43 = vsub.f32 %v2144_v28, %v2172_v42  ;;  %v2174_v1 = vsub.f32 %v2147_v27, %v2172_v42  ;;  %v2175_v45 = vsub.f32 %v2150_v25, %v2172_v42  ;;  %v2176_v6 = vsub.f32 %v2153_v30, %v2172_v42 }
0x242e   :  { %v2177_v40 = vsub.f32 %v2156_v31, %v2172_v42  ;;  %v2178_v58 = vsub.f32 %v2159_v32, %v2172_v42  ;;  %v2179_v46 = vsub.f32 %v2162_v36, %v2172_v42  ;;  %v2180_v59 = vsub.f32 %v2165_v35, %v2172_v42 }
0x242f   :  { %v2181_v47 = vmul.f32 1.442695, %v2173_v43  ;;  %v2183_v53 = vmul.f32 1.442695, %v2174_v1  ;;  %v2185_v50 = vmul.f32 1.442695, %v2175_v45 }
0x2430   :  { %v2187_v22 = vmul.f32 1.442695, %v2176_v6  ;;  %v2189_v0 = vmul.f32 1.442695, %v2177_v40  ;;  %v2191_v60 = vmul.f32 1.442695, %v2178_v58 }
0x2431   :  { %3148 = vpow2.f32 %v2181_v47  ;;  %v2193_v61 = vmul.f32 1.442695, %v2179_v46  ;;  %v2195_v62 = vmul.f32 1.442695, %v2180_v59  ;;  %v72_v40 = vld [vmem:[%s3826_s4 + $0xa] sm:$0x1] }
0x2432   :  { %3150 = vpow2.f32 %v2183_v53 }
0x2433   :  { %3152 = vpow2.f32 %v2185_v50 }
0x2434   :  { %3154 = vpow2.f32 %v2187_v22 }
0x2435   :  { %3156 = vpow2.f32 %v2189_v0 }
0x2436   :  { %3158 = vpow2.f32 %v2191_v60 }
0x2437   :  { %3160 = vpow2.f32 %v2193_v61 }
0x2438   :  { %3162 = vpow2.f32 %v2195_v62 }
0x243b   :  { %v3149_v2 = vpop.eup %3148 }
0x243c   :  { %v3151_v63 = vpop.eup %3150 }
0x243d   :  { %v2197_v3 = vadd.f32 %v3151_v63, %v3149_v2  ;;  %v3153_v5 = vpop.eup %3152 }
0x243e   :  { %v3155_v57 = vpop.eup %3154 }
0x243f   :  { %v2198_v9 = vadd.f32 %v3153_v5, %v2197_v3  ;;  %v3157_v10 = vpop.eup %3156 }
0x2440   :  { %v3159_v15 = vpop.eup %3158 }
0x2441   :  { %v2199_v21 = vadd.f32 %v3155_v57, %v2198_v9  ;;  %v3161_v24 = vpop.eup %3160 }
0x2442   :  { %v3163_v26 = vpop.eup %3162 }
0x2443   :  { %v2200_v11 = vadd.f32 %v3157_v10, %v2199_v21 }
0x2445   :  { %v2201_v8 = vadd.f32 %v3159_v15, %v2200_v11 }
0x2447   :  { %v2202_v16 = vadd.f32 %v3161_v24, %v2201_v8 }
0x2449   :  { %v2203_v29 = vadd.f32 %v3163_v26, %v2202_v16 }
0x244b   :  { %3164 = vrcp.f32 %v2203_v29 }
0x2455   :  { %v3165_v48 = vpop.eup %3164 }
0x2456   :  { %v2205_v49 = vmul.f32 %v3165_v48, %v3149_v2  ;;  %v2206_v7 = vmul.f32 %v3165_v48, %v3151_v63  ;;  %v2207_v54 = vmul.f32 %v3165_v48, %v3153_v5  ;;  %v2208_v20 = vmul.f32 %v3165_v48, %v3155_v57 }
0x2457   :  { %v2209_v52 = vmul.f32 %v3165_v48, %v3157_v10  ;;  %v2210_v44 = vmul.f32 %v3165_v48, %v3159_v15  ;;  %v2211_v31 = vmul.f32 %v3165_v48, %v3161_v24  ;;  %v2212_v36 = vmul.f32 %v3165_v48, %v3163_v26 }
0x2458   :  { %v2213_v18 = vmul.f32 %v2205_v49, %v3603_v13  ;;  %v2214_v55 = vmul.f32 %v2206_v7, %v3600_v12  ;;  %v2215_v4 = vmul.f32 %v2207_v54, %v3606_v14  ;;  %v2216_v27 = vmul.f32 %v2208_v20, %v3610_v17 }
0x2459   :  { %v2217_v32 = vmul.f32 %v2209_v52, %v3613_v19  ;;  %v2218_v13 = vmul.f32 %v2210_v44, %v3619_v51  ;;  %v2219_v37 = vmul.f32 %v2211_v31, %v3624_v23  ;;  %v2220_v38 = vmul.f32 %v2212_v36, %v3626_v56  ;;  %v70_v51 = vld [vmem:[%s3826_s4 + $0x7] sm:$0x1]  ;;  %v2467_v56 = vld [vmem:[%s3826_s4 + $0x6] ss:$0 sm:$0xff] }
0x245a   :  { %v2221_v28 = vsel %vm219_vm3, %v2213_v18, 0.0  ;;  %v2222_v25 = vsel %vm219_vm3, %v2214_v55, 0.0  ;;  %v2224_v33 = vsel %vm219_vm3, %v2215_v4, 0.0  ;;  %v2226_v12 = vsel %vm219_vm3, %v2216_v27, 0.0 }
0x245b   :  { %v2223_v30 = vadd.f32 %v2222_v25, %v2221_v28  ;;  %v2228_v17 = vsel %vm219_vm3, %v2217_v32, 0.0  ;;  %v2230_v39 = vsel %vm219_vm3, %v2218_v13, 0.0  ;;  %v2232_v19 = vsel %vm219_vm3, %v2219_v37, 0.0 }
0x245c   :  { %v2234_v43 = vsel %vm219_vm3, %v2220_v38, 0.0  ;;  %v3222_v23 = vmov 0  }
0x245d   :  { %v2225_v34 = vadd.f32 %v2224_v33, %v2223_v30  ;;  %2975 = vset.pattern.permute.xlu0 %v3222_v23 }
0x245e   :  { %2316 = vperm.xlu0 %2975, %v70_v51  }
0x245f   :  { %v2227_v14 = vadd.f32 %v2226_v12, %v2225_v34 }
0x2461   :  { %v2229_v35 = vadd.f32 %v2228_v17, %v2227_v14 }
0x2463   :  { %v2231_v41 = vadd.f32 %v2230_v39, %v2229_v35 }
0x2465   :  { %v2233_v42 = vadd.f32 %v2232_v19, %v2231_v41 }
0x2467   :  { %v2235_v1 = vadd.f32 %v2234_v43, %v2233_v42 }
0x2469   :  { %2834 = vmatmul.mubr.msk.f32.vlgmr.msra.gmra.mrb[22].mxu1 %vm219_vm3, %v2235_v1 }
0x24dd   :  { %v2317_v50 = vpop.permute.xlu0 %2316 }
0x253c   :  { %v2309_v45 = vpop.f32.mrb[22].mxu1 }
0x253d   :  { %v2310_v6 = vadd.f32 %v2467_v56, %v2309_v45  ;;  %v2835_v47 = vpop.f32.mrb[23].mxu1 }
0x253f   :  { %v2313_v53 = vmax.f32 %v2310_v6, 0.0 }
0x2541   :  { %2837 = vmatpush3.xpose.msk.msra.mxu0 %vm219_vm3, %v2313_v53 }
0x2544   :  { %2839 = vmatmul.mubr.msk.f32.vlgmr.msra.gmra.mrb[30].mxu0 %vm219_vm3, %v72_v40 }
0x2617   :  { %v2391_v58 = vpop.f32.mrb[30].mxu0 }
0x2618   :  { %v2392_v22 = vadd.f32 %v2391_v58, %v2317_v50  ;;  %v2840_v46 = vpop.f32.mrb[31].mxu0 }
0x261a   :  { %2396 = vst.msk [vmem:[#allocation7] sm:$0x1] %vm2395_vm5, %v2392_v22 }
0x261b   :  { %3199 = shalt.err (!%p3196_p12)
}
0x261c   :  { %s3200_s14 = scalar_lea.hbm %s3827_s5, 16 }
0x261d   :  { %p3201_p13 = scmp.ne.s32.totalorder %s3827_s5, %s3200_s14  ;;  %p3204_p0 = scmp.lt.u32.totalorder %s3200_s14, %s3827_s5 }
0x261f   :  { %p3206_p1 = pnand %p3204_p0, %p3201_p13 }
0x2621   :  { %3209 = shalt.err (!%p3206_p1)
}
0x2622   :  { %2406 = dma.vmem_to_hbm [thread:$0]  %s2404_s12, 16, %s3827_s5, [#allocation6]  }
0x2623   :  { %3212 = dma.done.wait [#allocation6], 16  }
0x2624   :  { %3213 = vsyncadd [#allocation6], 4294967280 }
0x2625   :  { %2410 = vsyncpa [#allocation5], 1 }
0x2626   :  { %2411 = vsyncpa [#allocation6], 1 }

</bundles_post_ra>
